<compile_context>
chip_gen: v5e
topology: v5e:2x2
jax: 0.10.0
libtpu: 0.0.40
codegen_flags: <defaults>
</compile_context>

<pallas_src>
import functools

import jax
import jax.numpy as jnp
from jax.experimental import pallas as pl
from jax.experimental.pallas import tpu as pltpu


def _bn_add_relu_kernel(x_ref, skip_ref, gb_ref, o_ref, *, eps, inv_count):
    """relu(skip + gamma * (x - mean) * rsqrt(var + eps) + beta).

    Block shapes (channels-last, lane-dense):
      x_ref, skip_ref, o_ref : (N, H*W, tile_c)   channels on the lane axis
      gb_ref                 : (2, tile_c)        row 0 = gamma, row 1 = beta
    Per-channel (= per-lane) batch statistics over (N, H*W); the reductions
    run over the batch/sublane axes only, so no cross-lane XLU traffic, and
    the output store is a wide unmasked vst.
    """
    x = x_ref[...].astype(jnp.float32)

    # Two-pass mean / variance (numerically safe); everything is VMEM-resident
    # so the second pass is cheap VPU work.
    mean = jnp.sum(x, axis=(0, 1), keepdims=True) * inv_count        # (1,1,tc)
    centered = x - mean
    var = jnp.sum(centered * centered, axis=(0, 1), keepdims=True) * inv_count
    inv_std = jax.lax.rsqrt(var + eps)                               # (1,1,tc)

    gb = gb_ref[...].astype(jnp.float32)                             # (2, tc)
    gamma = gb[0].reshape(1, 1, -1)
    beta = gb[1].reshape(1, 1, -1)

    y = centered * (gamma * inv_std) + beta
    y = y + skip_ref[...].astype(jnp.float32)                        # x411 + x425
    o_ref[...] = jnp.maximum(y, 0.0).astype(o_ref.dtype)             # ReLU


def _pick_tile_c(N, C, HW, itemsize=4, vmem_budget_bytes=10 * 1024 * 1024):
    """Channel (lane) tile: must be a multiple of 128, or C itself.

    Prefer the smallest multiple of 128 covering ceil(C/2) -> exactly two
    roughly balanced 'parallel' grid steps (keeps both v7x TensorCores busy
    and restores DMA/compute overlap on v5e/v6e), shrinking by 128 while a
    block would not fit a conservative cross-generation VMEM budget."""
    if C <= 128:
        return C
    hw_pad = -(-HW // 8) * 8

    def fits(tc):
        # x, skip, out blocks double-buffered by the pipeline + tiny (2, tc)
        # param block (also double-buffered).
        return (3 * 2 * N * hw_pad * tc + 2 * 2 * tc) * itemsize \
            <= vmem_budget_bytes

    half = -(-C // 2)
    tc = -(-half // 128) * 128
    tc = min(tc, -(-C // 128) * 128)
    while tc > 128 and not fits(tc):
        tc -= 128
    return tc


def bn_add_relu(x424, x411, gamma, beta, *, eps=1e-5, tile_c=None):
    """y = relu(x411 + batchnorm2d(x424)); NCHW in / NCHW out."""
    N, C, H, W = x424.shape
    assert x411.shape == x424.shape
    HW = H * W

    # Layout plumbing in the wrapper (tensors are ~170 KB, this is cheap):
    # NCHW -> (N, H*W, C) so channels land on the lane axis inside the kernel.
    x = jnp.transpose(x424, (0, 2, 3, 1)).reshape(N, HW, C)
    s = jnp.transpose(x411, (0, 2, 3, 1)).reshape(N, HW, C)
    gb = jnp.stack([gamma, beta], axis=0)                 # (2, C): one dense DMA

    if tile_c is None:
        tile_c = _pick_tile_c(N, C, HW, jnp.dtype(x424.dtype).itemsize)
    assert tile_c == C or tile_c % 128 == 0, (
        "tile_c must equal C or be a multiple of 128 (lane tiling)")

    grid = (pl.cdiv(C, tile_c),)
    out = pl.pallas_call(
        functools.partial(_bn_add_relu_kernel, eps=eps,
                          inv_count=1.0 / (N * HW)),
        out_shape=jax.ShapeDtypeStruct((N, HW, C), x424.dtype),
        grid=grid,
        in_specs=[
            pl.BlockSpec((N, HW, tile_c), lambda i: (0, 0, i)),
            pl.BlockSpec((N, HW, tile_c), lambda i: (0, 0, i)),
            pl.BlockSpec((2, tile_c), lambda i: (0, i)),
        ],
        out_specs=pl.BlockSpec((N, HW, tile_c), lambda i: (0, 0, i)),
        compiler_params=pltpu.CompilerParams(
            dimension_semantics=("parallel",)),
    )(x, s, gb)

    return jnp.transpose(out.reshape(N, H, W, C), (0, 3, 1, 2))


def _reference(x424, x411, gamma, beta, eps=1e-5):
    x = x424.astype(jnp.float32)
    mean = jnp.mean(x, axis=(0, 2, 3), keepdims=True)
    var = jnp.mean((x - mean) ** 2, axis=(0, 2, 3), keepdims=True)
    y = (x - mean) * jax.lax.rsqrt(var + eps)
    y = y * gamma.reshape(1, -1, 1, 1) + beta.reshape(1, -1, 1, 1)
    return jnp.maximum(y + x411.astype(jnp.float32), 0.0).astype(x424.dtype)


if __name__ == "__main__":
    key = jax.random.PRNGKey(0)
    k1, k2, k3, k4 = jax.random.split(key, 4)

    # Exact module shape: [1, 888, 7, 7] (~170 KB per tensor).
    N, C, H, W = 1, 888, 7, 7
    x424 = jax.random.normal(k1, (N, C, H, W), dtype=jnp.float32)
    x411 = jax.random.normal(k2, (N, C, H, W), dtype=jnp.float32)
    gamma = 1.0 + 0.1 * jax.random.normal(k3, (C,), dtype=jnp.float32)
    beta = 0.1 * jax.random.normal(k4, (C,), dtype=jnp.float32)

    out = jax.block_until_ready(bn_add_relu(x424, x411, gamma, beta))
    ref = _reference(x424, x411, gamma, beta)
    assert out.shape == (N, C, H, W)
    assert jnp.allclose(out, ref, atol=1e-4, rtol=1e-4), (
        float(jnp.max(jnp.abs(out - ref))))

    # Also exercise N > 1 and the tile_c == C (single-step) path.
    N2, C2, H2, W2 = 2, 16, 7, 7
    x424b = jax.random.normal(k3, (N2, C2, H2, W2), dtype=jnp.float32)
    x411b = jax.random.normal(k4, (N2, C2, H2, W2), dtype=jnp.float32)
    g2 = jnp.ones((C2,), jnp.float32)
    b2 = jnp.zeros((C2,), jnp.float32)
    out2 = jax.block_until_ready(bn_add_relu(x424b, x411b, g2, b2))
    ref2 = _reference(x424b, x411b, g2, b2)
    assert jnp.allclose(out2, ref2, atol=1e-4, rtol=1e-4)

    print("KERNEL_OK")
</pallas_src>

<mosaic_0001>
module attributes {stable_mosaic.version = 11 : i64} {
  func.func @_bn_add_relu_kernel(%arg0: i32, %arg1: memref<1x49x512xf32, #tpu.memory_space<vmem>>, %arg2: memref<1x49x512xf32, #tpu.memory_space<vmem>>, %arg3: memref<2x512xf32, #tpu.memory_space<vmem>>, %arg4: memref<1x49x512xf32, #tpu.memory_space<vmem>>) attributes {dimension_semantics = [#tpu.dimension_semantics<parallel>], iteration_bounds = array<i64: 2>, scalar_prefetch = 0 : i64, scratch_operands = 0 : i64, tpu.core_type = #tpu.core_type<tc>, window_params = [{transform_indices = @transform_0, window_bounds = array<i64: 1, 49, 512>}, {transform_indices = @transform_1, window_bounds = array<i64: 1, 49, 512>}, {transform_indices = @transform_2, window_bounds = array<i64: 2, 512>}, {transform_indices = @transform_3, window_bounds = array<i64: 1, 49, 512>}]} {
    %c0 = arith.constant 0 : index
    %c0_0 = arith.constant 0 : index
    %c0_1 = arith.constant 0 : index
    %0 = vector.load %arg1[%c0, %c0_0, %c0_1] : memref<1x49x512xf32, #tpu.memory_space<vmem>>, vector<1x49x512xf32>
    %cst = arith.constant dense<0.000000e+00> : vector<512xf32>
    %1 = vector.multi_reduction <add>, %0, %cst [0, 1] : vector<1x49x512xf32> to vector<512xf32>
    %2 = vector.shape_cast %1 : vector<512xf32> to vector<1x1x512xf32>
    %cst_2 = arith.constant 0.0204081628 : f32
    %3 = vector.broadcast %cst_2 : f32 to vector<1x1x512xf32>
    %4 = arith.mulf %2, %3 : vector<1x1x512xf32>
    %5 = vector.broadcast %4 : vector<1x1x512xf32> to vector<1x49x512xf32>
    %6 = arith.subf %0, %5 : vector<1x49x512xf32>
    %7 = arith.mulf %6, %6 : vector<1x49x512xf32>
    %cst_3 = arith.constant dense<0.000000e+00> : vector<512xf32>
    %8 = vector.multi_reduction <add>, %7, %cst_3 [0, 1] : vector<1x49x512xf32> to vector<512xf32>
    %9 = vector.shape_cast %8 : vector<512xf32> to vector<1x1x512xf32>
    %cst_4 = arith.constant 0.0204081628 : f32
    %10 = vector.broadcast %cst_4 : f32 to vector<1x1x512xf32>
    %11 = arith.mulf %9, %10 : vector<1x1x512xf32>
    %cst_5 = arith.constant 9.99999974E-6 : f32
    %12 = vector.broadcast %cst_5 : f32 to vector<1x1x512xf32>
    %13 = arith.addf %11, %12 : vector<1x1x512xf32>
    %14 = math.rsqrt %13 : vector<1x1x512xf32>
    %c0_6 = arith.constant 0 : index
    %c0_7 = arith.constant 0 : index
    %15 = vector.load %arg3[%c0_6, %c0_7] : memref<2x512xf32, #tpu.memory_space<vmem>>, vector<2x512xf32>
    %16 = vector.extract_strided_slice %15 {offsets = [0, 0], sizes = [1, 512], strides = [1, 1]} : vector<2x512xf32> to vector<1x512xf32>
    %17 = vector.shape_cast %16 : vector<1x512xf32> to vector<512xf32>
    %18 = vector.shape_cast %17 : vector<512xf32> to vector<1x1x512xf32>
    %19 = vector.extract_strided_slice %15 {offsets = [1, 0], sizes = [1, 512], strides = [1, 1]} : vector<2x512xf32> to vector<1x512xf32>
    %20 = vector.shape_cast %19 : vector<1x512xf32> to vector<512xf32>
    %21 = vector.shape_cast %20 : vector<512xf32> to vector<1x1x512xf32>
    %22 = arith.mulf %18, %14 : vector<1x1x512xf32>
    %23 = vector.broadcast %22 : vector<1x1x512xf32> to vector<1x49x512xf32>
    %24 = arith.mulf %6, %23 : vector<1x49x512xf32>
    %25 = vector.broadcast %21 : vector<1x1x512xf32> to vector<1x49x512xf32>
    %26 = arith.addf %24, %25 : vector<1x49x512xf32>
    %c0_8 = arith.constant 0 : index
    %c0_9 = arith.constant 0 : index
    %c0_10 = arith.constant 0 : index
    %27 = vector.load %arg2[%c0_8, %c0_9, %c0_10] : memref<1x49x512xf32, #tpu.memory_space<vmem>>, vector<1x49x512xf32>
    %28 = arith.addf %26, %27 : vector<1x49x512xf32>
    %cst_11 = arith.constant 0.000000e+00 : f32
    %29 = vector.broadcast %cst_11 : f32 to vector<1x49x512xf32>
    %30 = arith.maximumf %28, %29 : vector<1x49x512xf32>
    %c0_12 = arith.constant 0 : index
    %c0_13 = arith.constant 0 : index
    %c0_14 = arith.constant 0 : index
    %31 = vector.load %arg4[%c0_12, %c0_13, %c0_14] : memref<1x49x512xf32, #tpu.memory_space<vmem>>, vector<1x49x512xf32>
    tpu.vector_store %arg4[%c0_12, %c0_13, %c0_14], %30 {strides = array<i32>} : memref<1x49x512xf32, #tpu.memory_space<vmem>>, vector<1x49x512xf32>,
    return
  }
  func.func @transform_0(%arg0: i32) -> (i32, i32, i32) {
    %c0_i32 = arith.constant 0 : i32
    %c0_i32_0 = arith.constant 0 : i32
    %c0_i32_1 = arith.constant 0 : i32
    return %c0_i32, %c0_i32_0, %arg0 : i32, i32, i32
  }
  func.func @transform_1(%arg0: i32) -> (i32, i32, i32) {
    %c0_i32 = arith.constant 0 : i32
    %c0_i32_0 = arith.constant 0 : i32
    %c0_i32_1 = arith.constant 0 : i32
    return %c0_i32, %c0_i32_0, %arg0 : i32, i32, i32
  }
  func.func @transform_2(%arg0: i32) -> (i32, i32) {
    %c0_i32 = arith.constant 0 : i32
    %c0_i32_0 = arith.constant 0 : i32
    return %c0_i32, %arg0 : i32, i32
  }
  func.func @transform_3(%arg0: i32) -> (i32, i32, i32) {
    %c0_i32 = arith.constant 0 : i32
    %c0_i32_0 = arith.constant 0 : i32
    %c0_i32_1 = arith.constant 0 : i32
    return %c0_i32, %c0_i32_0, %arg0 : i32, i32, i32
  }
}

</mosaic_0001>

<bundles_post_ra>
// kernel: tpu_custom_call.1
= control target key start
LH: loop header
LB: loop body
LE: loop exit
PB: predicated region body
PF: predicated region fallthrough
CT: control target
= control target key end

     0   :  { %s3103_s12 = smov 0   ;;  %s3105_s13 = smov 0   ;;  %s4683_s0 = inlined_call_operand.vmem [shape: f32[1,49,888], index: 0, kind: input, shape index: {}]   ;;  %s4684_s1 = inlined_call_operand.vmem [shape: f32[1,49,888], index: 1, kind: input, shape index: {}]   ;;  %s4685_s2 = inlined_call_operand.vmem [shape: f32[2,888], index: 2, kind: input, shape index: {}]   ;;  %s4686_s3 = inlined_call_operand.vmem [shape: f32[1,49,888], index: 3, kind: output, shape index: {}]  }
   0x1   :  { %s3107_s14 = smov 0  }
   0x2 LB: > { %s3119_s15 = sadd.s32 4294967295, %s2883_s14   ;;  %s3122_s16 = sadd.s32 1, %s2883_s14   ;;  %s2883_s14 = sphi %s3107_s14, %s4747_s14   ;;  %s2879_s13 = sphi %s3105_s13, %s4746_s13   ;;  %s2875_s12 = sphi %s3103_s12, %s4745_s12  }
   0x3   : > { %s17_s17 = ssub.s32 %s2883_s14, %s3122_s16  ;;  %s20_s18 = sadd.s32 1, %s2879_s13 }
   0x4   : > { %p18_p0 = scmp.eq.s32.totalorder %s17_s17, 0  ;;  %p27_p1 = scmp.ne.s32.totalorder %s2879_s13, %s2875_s12 }
   0x5   : > { %p28_p2 = scmp.eq.s32.totalorder %s2883_s14, 0  ;;  %p109_p3 = scmp.eq.s32.totalorder %s3119_s15, 1 }
   0x6   : > { %s3132_s19 = scalar_select %p18_p0, %s2879_s13, %s20_s18  }
   0x7   : > { %p3134_p4 = por %p28_p2, %p27_p1  ;;  %p3138_p5 = por %p109_p3, %p27_p1 }
   0x8   : > { %p2130_p6 = scmp.ge.s32.totalorder %s2883_s14, 2 }
   0xa   : > { %131 = sbr.rel (%p2130_p6) target bundleno = 409 (0x199), region = 16 }
   0xf   : > { %134 = sbr.rel (!%p3134_p4) target bundleno = 212 (0xd4), region = 20  ;;  %s136_s22 = sand.u32 (%p3134_p4), 1, %s2879_s13  }
  0x10   : > { %s2131_s23 = sshll.u32 (%p3134_p4), %s2883_s14, 2  ;;  %s2202_s24 = smul.u32 (%p3134_p4), 224, %s136_s22 }
  0x11   : > { %s140_s25 = ssub.s32 (%p3134_p4), 7, %s2131_s23  ;;  %s2199_s26 = sshll.u32 (%p3134_p4), %s2883_s14, 5 }
  0x12   : > { %p141_p7 = scmp.lt.s32.totalorder (%p3134_p4), %s140_s25, 4  ;;  %s3151_s29 = scalar_lea.vmem (%p3134_p4), %s4683_s0, %s2199_s26  }
  0x13   : > { %s3155_s5 = scalar_lea.vmem (%p3134_p4), [#allocation2], %s2202_s24  }
  0x14   : > { %s4749_s25 = smov (!%p141_p7, %s140_s25), 4 }
  0x15   : > { %s143_s30 = smul.u32 56, %s4749_s25  ;;  %s3153_s4 = sshll.u32 %s4749_s25, 3 }
  0x17   : > { %p2135_p8 = scmp.eq.s32.totalorder %s143_s30, 0 }
  0x18   : > { %p151_p9 = scmp.lt.u32.totalorder (!%p2135_p8), %s3153_s4, 8 }
  0x19   : > { %150 = sbr.rel (%p2135_p8) target bundleno = 212 (0xd4), region = 24 }
  0x1e   : > { %154 = sbr.rel (%p151_p9) target bundleno = 197 (0xc5), region = 28  ;;  %s3159_s6 = sand.u32 (!%p151_p9), 7, %s3153_s4  }
  0x1f   : > { %p183_p10 = scmp.eq.s32.totalorder (!%p151_p9), %s3159_s6, 0  ;;  %p2136_p11 = scmp.ne.s32.totalorder (!%p151_p9), %s3159_s6, 0 }
  0x23   : > { %186 = sbr.rel (%p2136_p11) target bundleno = 110 (0x6e), region = 43  ;;  %s187_s7 = sshrl.u32 (!%p2136_p11), %s3153_s4, 3 }
  0x24   : > { %2625 = sdivrem.u32 (!%p2136_p11), %s187_s7, 6 }
  0x2d   : > { %s3166_s8 = spop.drf %2625 }
  0x2e   : > { %s2627_s9 = spop.drf %2625  ;;  %p2137_p12 = scmp.le.s32.totalorder %s3166_s8, 0 }
  0x2f   : > { %s4689_s10 = smov (!%p2137_p12), %s3155_s5  ;;  %s4690_s11 = smov (!%p2137_p12), %s3151_s29 }
  0x30   : > { %1932 = sbr.rel (%p2137_p12) target bundleno = 84 (0x54), region = 324  ;;  %s3175_s17 = smov (!%p2137_p12), 0  }
  0x31   : > { %s3177_s18 = smov (!%p2137_p12), 0  }
  0x35 LB: >> { %v199_v0 = vld [vmem:[%s2891_s11] sm:$0xff]  ;;  %v201_v1 = vld [vmem:[%s2891_s11 + $0x8] sm:$0xff]  ;;  %v203_v2 = vld [vmem:[%s2891_s11 + $0x10] sm:$0xff]  ;;  %s283_s22 = sadd.s32 1, %s2895_s17  ;;  %s193_s18 = sadd.s32 1, %s2899_s18   ;;  %s2899_s18 = sphi %s3177_s18, %s193_s18   ;;  %s2895_s17 = sphi %s3175_s17, %s4693_s17   ;;  %s2891_s11 = sphi %s4690_s11, %s4692_s11   ;;  %s2887_s10 = sphi %s4689_s10, %s4691_s10  }
  0x36   : >> { %200 = vst [vmem:[%s2887_s10] sm:$0xff] %v199_v0  ;;  %v205_v3 = vld [vmem:[%s2891_s11 + $0x18] sm:$0xff]  ;;  %v213_v5 = vld [vmem:[%s2891_s11 + $0x40] sm:$0xff]  ;;  %p284_p13 = scmp.ge.s32.totalorder %s283_s22, %s3166_s8  ;;  %v215_v6 = vld [vmem:[%s2891_s11 + $0x48] sm:$0xff]  ;;  %p192_p0 = scmp.ge.s32.totalorder %s193_s18, %s3166_s8 }
  0x37   : >> { %202 = vst [vmem:[%s2887_s10 + $0x8] sm:$0xff] %v201_v1  ;;  %v211_v4 = vld [vmem:[%s2891_s11 + $0x38] sm:$0xff]  ;;  %v217_v7 = vld [vmem:[%s2891_s11 + $0x50] sm:$0xff]  ;;  %v227_v10 = vld [vmem:[%s2891_s11 + $0x80] sm:$0xff] }
  0x38   : >> { %204 = vst [vmem:[%s2887_s10 + $0x10] sm:$0xff] %v203_v2  ;;  %s4751_s22 = smov (%p284_p13, %s283_s22), 0  ;;  %v223_v8 = vld [vmem:[%s2891_s11 + $0x70] sm:$0xff]  ;;  %v225_v9 = vld [vmem:[%s2891_s11 + $0x78] sm:$0xff]  ;;  %v229_v11 = vld [vmem:[%s2891_s11 + $0x88] sm:$0xff] }
  0x39   : >> { %206 = vst [vmem:[%s2887_s10 + $0x18] sm:$0xff] %v205_v3  ;;  %s286_s23 = smul.u32 48, %s4751_s22  ;;  %v235_v12 = vld [vmem:[%s2891_s11 + $0xa8] sm:$0xff]  ;;  %v237_v13 = vld [vmem:[%s2891_s11 + $0xb0] sm:$0xff]  ;;  %v239_v14 = vld [vmem:[%s2891_s11 + $0xb8] sm:$0xff]  ;;  %s4693_s17 = smov %s4751_s22 }
  0x3a   : >> { %212 = vst [vmem:[%s2887_s10 + $0x20] sm:$0xff] %v211_v4  ;;  %v241_v15 = vld [vmem:[%s2891_s11 + $0xc0] sm:$0xff]  ;;  %v249_v17 = vld [vmem:[%s2891_s11 + $0xe8] sm:$0xff]  ;;  %v251_v18 = vld [vmem:[%s2891_s11 + $0xf0] sm:$0xff] }
  0x3b   : >> { %214 = vst [vmem:[%s2887_s10 + $0x28] sm:$0xff] %v213_v5  ;;  %s3215_s24 = scalar_lea.vmem %s3151_s29, %s286_s23   ;;  %s3218_s25 = scalar_lea.vmem %s3155_s5, %s286_s23 [#allocation2]   ;;  %v247_v16 = vld [vmem:[%s2891_s11 + $0xe0] sm:$0xff]  ;;  %v253_v19 = vld [vmem:[%s2891_s11 + $0xf8] sm:$0xff]  ;;  %v263_v22 = vld [vmem:[%s2891_s11 + $0x128] sm:$0xff] }
  0x3c   : >> { %216 = vst [vmem:[%s2887_s10 + $0x30] sm:$0xff] %v215_v6  ;;  %v259_v20 = vld [vmem:[%s2891_s11 + $0x118] sm:$0xff]  ;;  %v261_v21 = vld [vmem:[%s2891_s11 + $0x120] sm:$0xff]  ;;  %v265_v23 = vld [vmem:[%s2891_s11 + $0x130] sm:$0xff] }
  0x3d   : >> { %218 = vst [vmem:[%s2887_s10 + $0x38] sm:$0xff] %v217_v7  ;;  %v271_v24 = vld [vmem:[%s2891_s11 + $0x150] sm:$0xff]  ;;  %v273_v25 = vld [vmem:[%s2891_s11 + $0x158] sm:$0xff]  ;;  %v275_v26 = vld [vmem:[%s2891_s11 + $0x160] sm:$0xff] }
  0x3e   : >> { %224 = vst [vmem:[%s2887_s10 + $0x40] sm:$0xff] %v223_v8  ;;  %v277_v27 = vld [vmem:[%s2891_s11 + $0x168] sm:$0xff]  ;;  %v279_v28 = vld [vmem:[%s2891_s11 + $0x170] sm:$0xff]  ;;  %v281_v29 = vld [vmem:[%s2891_s11 + $0x178] sm:$0xff]  ;;  %s4692_s11 = smov %s3215_s24 }
  0x3f   : >> { %226 = vst [vmem:[%s2887_s10 + $0x48] sm:$0xff] %v225_v9 }
  0x40   : >> { %228 = vst [vmem:[%s2887_s10 + $0x50] sm:$0xff] %v227_v10 }
  0x41   : >> { %230 = vst [vmem:[%s2887_s10 + $0x58] sm:$0xff] %v229_v11 }
  0x42   : >> { %236 = vst [vmem:[%s2887_s10 + $0x60] sm:$0xff] %v235_v12 }
  0x43   : >> { %238 = vst [vmem:[%s2887_s10 + $0x68] sm:$0xff] %v237_v13 }
  0x44   : >> { %240 = vst [vmem:[%s2887_s10 + $0x70] sm:$0xff] %v239_v14 }
  0x45   : >> { %242 = vst [vmem:[%s2887_s10 + $0x78] sm:$0xff] %v241_v15 }
  0x46   : >> { %248 = vst [vmem:[%s2887_s10 + $0x80] sm:$0xff] %v247_v16 }
  0x47   : >> { %250 = vst [vmem:[%s2887_s10 + $0x88] sm:$0xff] %v249_v17 }
  0x48   : >> { %252 = vst [vmem:[%s2887_s10 + $0x90] sm:$0xff] %v251_v18 }
  0x49   : >> { %254 = vst [vmem:[%s2887_s10 + $0x98] sm:$0xff] %v253_v19 }
  0x4a   : >> { %260 = vst [vmem:[%s2887_s10 + $0xa0] sm:$0xff] %v259_v20 }
  0x4b   : >> { %262 = vst [vmem:[%s2887_s10 + $0xa8] sm:$0xff] %v261_v21 }
  0x4c   : >> { %264 = vst [vmem:[%s2887_s10 + $0xb0] sm:$0xff] %v263_v22 }
  0x4d   : >> { %266 = vst [vmem:[%s2887_s10 + $0xb8] sm:$0xff] %v265_v23 }
  0x4e   : >> { %272 = vst [vmem:[%s2887_s10 + $0xc0] sm:$0xff] %v271_v24 }
  0x4f   : >> { %274 = vst [vmem:[%s2887_s10 + $0xc8] sm:$0xff] %v273_v25  ;;  %195 = sbr.rel (!%p192_p0) target bundleno = 53 (0x35), region = 330 }
  0x50   : >> { %276 = vst [vmem:[%s2887_s10 + $0xd0] sm:$0xff] %v275_v26 }
  0x51   : >> { %278 = vst [vmem:[%s2887_s10 + $0xd8] sm:$0xff] %v277_v27 }
  0x52   : >> { %280 = vst [vmem:[%s2887_s10 + $0xe0] sm:$0xff] %v279_v28 }
  0x53   : >> { %282 = vst [vmem:[%s2887_s10 + $0xe8] sm:$0xff] %v281_v29  ;;  %s4691_s10 = smov %s3218_s25 }
  0x54 PF: > { %2628 = sdivrem.u32 %s187_s7, 6 }
  0x55   : > { %s2138_s26 = smul.u32 48, %s3166_s8 }
  0x57   : > { %s3276_s27 = scalar_lea.vmem %s3151_s29, %s2138_s26   ;;  %s3279_s28 = scalar_lea.vmem %s3155_s5, %s2138_s26 [#allocation2]  }
  0x5d   : > { %s2629_s30 = spop.drf %2628 }
  0x5e   : > { %s3281_s9 = spop.drf %2628 }
  0x5f   : > { %p2140_p1 = scmp.le.s32.totalorder %s3281_s9, 0 }
  0x60   : > { %s4694_s10 = smov (!%p2140_p1), %s3279_s28  ;;  %s4695_s11 = smov (!%p2140_p1), %s3276_s27 }
  0x61   : > { %1946 = sbr.rel (%p2140_p1) target bundleno = 110 (0x6e), region = 335  ;;  %s3290_s17 = smov (!%p2140_p1), 0  }
  0x62   : > { %s3292_s7 = smov (!%p2140_p1), 0  }
  0x66 LB: >> { %v306_v30 = vld [vmem:[%s2907_s11] sm:$0xff]  ;;  %v308_v31 = vld [vmem:[%s2907_s11 + $0x38] sm:$0xff]  ;;  %v310_v32 = vld [vmem:[%s2907_s11 + $0x70] sm:$0xff]  ;;  %s320_s8 = sadd.s32 1, %s2911_s17  ;;  %s300_s7 = sadd.s32 1, %s2915_s7   ;;  %s2915_s7 = sphi %s3292_s7, %s300_s7   ;;  %s2911_s17 = sphi %s3290_s17, %s4697_s17   ;;  %s2907_s11 = sphi %s4695_s11, %s325_s11   ;;  %s2903_s10 = sphi %s4694_s10, %s4696_s10  }
  0x67   : >> { %307 = vst [vmem:[%s2903_s10] sm:$0xff] %v306_v30  ;;  %v312_v33 = vld [vmem:[%s2907_s11 + $0xa8] sm:$0xff]  ;;  %p321_p2 = scmp.ge.s32.totalorder %s320_s8, %s3281_s9  ;;  %v314_v34 = vld [vmem:[%s2907_s11 + $0xe0] sm:$0xff]  ;;  %v316_v35 = vld [vmem:[%s2907_s11 + $0x118] sm:$0xff]  ;;  %p299_p3 = scmp.ge.s32.totalorder %s300_s7, %s3281_s9 }
  0x68   : >> { %309 = vst [vmem:[%s2903_s10 + $0x20] sm:$0xff] %v308_v31  ;;  %v318_v36 = vld [vmem:[%s2907_s11 + $0x150] sm:$0xff] }
  0x69   : >> { %311 = vst [vmem:[%s2903_s10 + $0x40] sm:$0xff] %v310_v32  ;;  %s4753_s8 = smov (%p321_p2, %s320_s8), 0  ;;  %302 = sbr.rel (!%p299_p3) target bundleno = 102 (0x66), region = 341 }
  0x6a   : >> { %313 = vst [vmem:[%s2903_s10 + $0x60] sm:$0xff] %v312_v33  ;;  %s2141_s18 = sshll.u32 %s4753_s8, 3  ;;  %s4697_s17 = smov %s4753_s8 }
  0x6b   : >> { %315 = vst [vmem:[%s2903_s10 + $0x80] sm:$0xff] %v314_v34  ;;  %s325_s11 = scalar_lea.vmem %s3276_s27, %s2141_s18   ;;  %s326_s22 = scalar_lea.vmem %s3279_s28, %s2141_s18 [#allocation2]  }
  0x6c   : >> { %317 = vst [vmem:[%s2903_s10 + $0xa0] sm:$0xff] %v316_v35 }
  0x6d   : >> { %319 = vst [vmem:[%s2903_s10 + $0xc0] sm:$0xff] %v318_v36  ;;  %s4696_s10 = smov %s326_s22 }
  0x6e PF: > { %329 = sbr.rel (%p183_p10) target bundleno = 197 (0xc5), region = 61  ;;  %s331_s23 = ssub.s32 (!%p183_p10), %s3153_s4, %s3159_s6 }
  0x6f   : > { %s335_s24 = sshrl.u32 (!%p183_p10), %s3153_s4, 3  ;;  %s3316_s25 = scalar_lea.vmem (!%p183_p10), %s3151_s29, %s331_s23 }
  0x70   : > { %s3319_s26 = scalar_lea.vmem (!%p183_p10), %s3155_s5, %s331_s23 [#allocation2]  ;;  %2631 = sdivrem.u32 (!%p183_p10), %s335_s24, 6 }
  0x79   : > { %s3323_s30 = spop.drf %2631 }
  0x7a   : > { %s2633_s27 = spop.drf %2631  ;;  %p2143_p6 = scmp.le.s32.totalorder %s3323_s30, 0 }
  0x7b   : > { %s4698_s28 = smov (!%p2143_p6), %s3155_s5  ;;  %s4699_s9 = smov (!%p2143_p6), %s3151_s29 }
  0x7c   : > { %1960 = sbr.rel (%p2143_p6) target bundleno = 160 (0xa0), region = 346  ;;  %s3332_s10 = smov (!%p2143_p6), 0  }
  0x7d   : > { %s3334_s11 = smov (!%p2143_p6), 0  }
  0x81 LB: >> { %v347_v37 = vld [vmem:[%s2923_s9] sm:$0xff]  ;;  %v349_v38 = vld [vmem:[%s2923_s9 + $0x8] sm:$0xff]  ;;  %v351_v39 = vld [vmem:[%s2923_s9 + $0x10] sm:$0xff]  ;;  %s431_s17 = sadd.s32 1, %s2927_s10  ;;  %s341_s11 = sadd.s32 1, %s2931_s11   ;;  %s2931_s11 = sphi %s3334_s11, %s341_s11   ;;  %s2927_s10 = sphi %s3332_s10, %s4702_s10   ;;  %s2923_s9 = sphi %s4699_s9, %s4701_s9   ;;  %s2919_s28 = sphi %s4698_s28, %s4700_s28  }
  0x82   : >> { %348 = vst [vmem:[%s2919_s28] sm:$0xff] %v347_v37  ;;  %v353_v40 = vld [vmem:[%s2923_s9 + $0x18] sm:$0xff]  ;;  %v361_v42 = vld [vmem:[%s2923_s9 + $0x40] sm:$0xff]  ;;  %p432_p7 = scmp.ge.s32.totalorder %s431_s17, %s3323_s30  ;;  %v363_v43 = vld [vmem:[%s2923_s9 + $0x48] sm:$0xff]  ;;  %p340_p8 = scmp.ge.s32.totalorder %s341_s11, %s3323_s30 }
  0x83   : >> { %350 = vst [vmem:[%s2919_s28 + $0x8] sm:$0xff] %v349_v38  ;;  %v359_v41 = vld [vmem:[%s2923_s9 + $0x38] sm:$0xff]  ;;  %v365_v44 = vld [vmem:[%s2923_s9 + $0x50] sm:$0xff]  ;;  %v375_v47 = vld [vmem:[%s2923_s9 + $0x80] sm:$0xff] }
  0x84   : >> { %352 = vst [vmem:[%s2919_s28 + $0x10] sm:$0xff] %v351_v39  ;;  %s4755_s17 = smov (%p432_p7, %s431_s17), 0  ;;  %v371_v45 = vld [vmem:[%s2923_s9 + $0x70] sm:$0xff]  ;;  %v373_v46 = vld [vmem:[%s2923_s9 + $0x78] sm:$0xff]  ;;  %v377_v48 = vld [vmem:[%s2923_s9 + $0x88] sm:$0xff] }
  0x85   : >> { %354 = vst [vmem:[%s2919_s28 + $0x18] sm:$0xff] %v353_v40  ;;  %s434_s7 = smul.u32 48, %s4755_s17  ;;  %v383_v49 = vld [vmem:[%s2923_s9 + $0xa8] sm:$0xff]  ;;  %v385_v50 = vld [vmem:[%s2923_s9 + $0xb0] sm:$0xff]  ;;  %v387_v51 = vld [vmem:[%s2923_s9 + $0xb8] sm:$0xff]  ;;  %s4702_s10 = smov %s4755_s17 }
  0x86   : >> { %360 = vst [vmem:[%s2919_s28 + $0x20] sm:$0xff] %v359_v41  ;;  %v389_v52 = vld [vmem:[%s2923_s9 + $0xc0] sm:$0xff]  ;;  %v397_v54 = vld [vmem:[%s2923_s9 + $0xe8] sm:$0xff]  ;;  %v399_v55 = vld [vmem:[%s2923_s9 + $0xf0] sm:$0xff] }
  0x87   : >> { %362 = vst [vmem:[%s2919_s28 + $0x28] sm:$0xff] %v361_v42  ;;  %s3372_s8 = scalar_lea.vmem %s3151_s29, %s434_s7   ;;  %s3375_s18 = scalar_lea.vmem %s3155_s5, %s434_s7 [#allocation2]   ;;  %v395_v53 = vld [vmem:[%s2923_s9 + $0xe0] sm:$0xff]  ;;  %v401_v56 = vld [vmem:[%s2923_s9 + $0xf8] sm:$0xff]  ;;  %v411_v59 = vld [vmem:[%s2923_s9 + $0x128] sm:$0xff] }
  0x88   : >> { %364 = vst [vmem:[%s2919_s28 + $0x30] sm:$0xff] %v363_v43  ;;  %v407_v57 = vld [vmem:[%s2923_s9 + $0x118] sm:$0xff]  ;;  %v409_v58 = vld [vmem:[%s2923_s9 + $0x120] sm:$0xff]  ;;  %v413_v60 = vld [vmem:[%s2923_s9 + $0x130] sm:$0xff] }
  0x89   : >> { %366 = vst [vmem:[%s2919_s28 + $0x38] sm:$0xff] %v365_v44  ;;  %v419_v61 = vld [vmem:[%s2923_s9 + $0x150] sm:$0xff]  ;;  %v421_v62 = vld [vmem:[%s2923_s9 + $0x158] sm:$0xff]  ;;  %v423_v63 = vld [vmem:[%s2923_s9 + $0x160] sm:$0xff] }
  0x8a   : >> { %372 = vst [vmem:[%s2919_s28 + $0x40] sm:$0xff] %v371_v45  ;;  %v425_v0 = vld [vmem:[%s2923_s9 + $0x168] sm:$0xff]  ;;  %v427_v1 = vld [vmem:[%s2923_s9 + $0x170] sm:$0xff]  ;;  %v429_v2 = vld [vmem:[%s2923_s9 + $0x178] sm:$0xff]  ;;  %s4701_s9 = smov %s3372_s8 }
  0x8b   : >> { %374 = vst [vmem:[%s2919_s28 + $0x48] sm:$0xff] %v373_v46 }
  0x8c   : >> { %376 = vst [vmem:[%s2919_s28 + $0x50] sm:$0xff] %v375_v47 }
  0x8d   : >> { %378 = vst [vmem:[%s2919_s28 + $0x58] sm:$0xff] %v377_v48 }
  0x8e   : >> { %384 = vst [vmem:[%s2919_s28 + $0x60] sm:$0xff] %v383_v49 }
  0x8f   : >> { %386 = vst [vmem:[%s2919_s28 + $0x68] sm:$0xff] %v385_v50 }
  0x90   : >> { %388 = vst [vmem:[%s2919_s28 + $0x70] sm:$0xff] %v387_v51 }
  0x91   : >> { %390 = vst [vmem:[%s2919_s28 + $0x78] sm:$0xff] %v389_v52 }
  0x92   : >> { %396 = vst [vmem:[%s2919_s28 + $0x80] sm:$0xff] %v395_v53 }
  0x93   : >> { %398 = vst [vmem:[%s2919_s28 + $0x88] sm:$0xff] %v397_v54 }
  0x94   : >> { %400 = vst [vmem:[%s2919_s28 + $0x90] sm:$0xff] %v399_v55 }
  0x95   : >> { %402 = vst [vmem:[%s2919_s28 + $0x98] sm:$0xff] %v401_v56 }
  0x96   : >> { %408 = vst [vmem:[%s2919_s28 + $0xa0] sm:$0xff] %v407_v57 }
  0x97   : >> { %410 = vst [vmem:[%s2919_s28 + $0xa8] sm:$0xff] %v409_v58 }
  0x98   : >> { %412 = vst [vmem:[%s2919_s28 + $0xb0] sm:$0xff] %v411_v59 }
  0x99   : >> { %414 = vst [vmem:[%s2919_s28 + $0xb8] sm:$0xff] %v413_v60 }
  0x9a   : >> { %420 = vst [vmem:[%s2919_s28 + $0xc0] sm:$0xff] %v419_v61 }
  0x9b   : >> { %422 = vst [vmem:[%s2919_s28 + $0xc8] sm:$0xff] %v421_v62  ;;  %343 = sbr.rel (!%p340_p8) target bundleno = 129 (0x81), region = 352 }
  0x9c   : >> { %424 = vst [vmem:[%s2919_s28 + $0xd0] sm:$0xff] %v423_v63 }
  0x9d   : >> { %426 = vst [vmem:[%s2919_s28 + $0xd8] sm:$0xff] %v425_v0 }
  0x9e   : >> { %428 = vst [vmem:[%s2919_s28 + $0xe0] sm:$0xff] %v427_v1 }
  0x9f   : >> { %430 = vst [vmem:[%s2919_s28 + $0xe8] sm:$0xff] %v429_v2  ;;  %s4700_s28 = smov %s3375_s18 }
  0xa0 PF: > { %2634 = sdivrem.u32 %s335_s24, 6 }
  0xa1   : > { %s2144_s22 = smul.u32 48, %s3323_s30 }
  0xa3   : > { %s3433_s23 = scalar_lea.vmem %s3151_s29, %s2144_s22   ;;  %s3436_s27 = scalar_lea.vmem %s3155_s5, %s2144_s22 [#allocation2]  }
  0xa9   : > { %s2635_s7 = spop.drf %2634 }
  0xaa   : > { %s3438_s18 = spop.drf %2634 }
  0xab   : > { %p2146_p9 = scmp.le.s32.totalorder %s3438_s18, 0 }
  0xac   : > { %s4703_s28 = smov (!%p2146_p9), %s3436_s27  ;;  %s4704_s9 = smov (!%p2146_p9), %s3433_s23 }
  0xad   : > { %1974 = sbr.rel (%p2146_p9) target bundleno = 186 (0xba), region = 357  ;;  %s3447_s10 = smov (!%p2146_p9), 0  }
  0xae   : > { %s3449_s24 = smov (!%p2146_p9), 0  }
  0xb2 LB: >> { %v454_v3 = vld [vmem:[%s2939_s9] sm:$0xff]  ;;  %v456_v4 = vld [vmem:[%s2939_s9 + $0x38] sm:$0xff]  ;;  %v458_v5 = vld [vmem:[%s2939_s9 + $0x70] sm:$0xff]  ;;  %s468_s30 = sadd.s32 1, %s2943_s10  ;;  %s448_s24 = sadd.s32 1, %s2947_s24   ;;  %s2947_s24 = sphi %s3449_s24, %s448_s24   ;;  %s2943_s10 = sphi %s3447_s10, %s4706_s10   ;;  %s2939_s9 = sphi %s4704_s9, %s473_s9   ;;  %s2935_s28 = sphi %s4703_s28, %s4705_s28  }
  0xb3   : >> { %455 = vst [vmem:[%s2935_s28] sm:$0xff] %v454_v3  ;;  %v460_v6 = vld [vmem:[%s2939_s9 + $0xa8] sm:$0xff]  ;;  %p469_p10 = scmp.ge.s32.totalorder %s468_s30, %s3438_s18  ;;  %v462_v7 = vld [vmem:[%s2939_s9 + $0xe0] sm:$0xff]  ;;  %v464_v8 = vld [vmem:[%s2939_s9 + $0x118] sm:$0xff]  ;;  %p447_p11 = scmp.ge.s32.totalorder %s448_s24, %s3438_s18 }
  0xb4   : >> { %457 = vst [vmem:[%s2935_s28 + $0x20] sm:$0xff] %v456_v4  ;;  %v466_v9 = vld [vmem:[%s2939_s9 + $0x150] sm:$0xff] }
  0xb5   : >> { %459 = vst [vmem:[%s2935_s28 + $0x40] sm:$0xff] %v458_v5  ;;  %s4757_s30 = smov (%p469_p10, %s468_s30), 0  ;;  %450 = sbr.rel (!%p447_p11) target bundleno = 178 (0xb2), region = 363 }
  0xb6   : >> { %461 = vst [vmem:[%s2935_s28 + $0x60] sm:$0xff] %v460_v6  ;;  %s2147_s11 = sshll.u32 %s4757_s30, 3  ;;  %s4706_s10 = smov %s4757_s30 }
  0xb7   : >> { %463 = vst [vmem:[%s2935_s28 + $0x80] sm:$0xff] %v462_v7  ;;  %s473_s9 = scalar_lea.vmem %s3433_s23, %s2147_s11   ;;  %s474_s17 = scalar_lea.vmem %s3436_s27, %s2147_s11 [#allocation2]  }
  0xb8   : >> { %465 = vst [vmem:[%s2935_s28 + $0xa0] sm:$0xff] %v464_v8 }
  0xb9   : >> { %467 = vst [vmem:[%s2935_s28 + $0xc0] sm:$0xff] %v466_v9  ;;  %s4705_s28 = smov %s474_s17 }
  0xba PF: > { %s3077_s8 = smov 1  }
  0xbb   : > { %s475_s22 = sshll.u32 %s3077_s8, %s3159_s6 }
  0xbc   : > { %s2149_s7 = sadd.s32 4294967295, %s475_s22 }
  0xbd   : > { %v485_v10 = vld [vmem:[%s3316_s25] sm:%s2149_s7]  ;;  %v487_v11 = vld [vmem:[%s3316_s25 + $0x38] sm:%s2149_s7] }
  0xbe   : > { %486 = vst [vmem:[%s3319_s26] sm:%s2149_s7] %v485_v10  ;;  %v489_v12 = vld [vmem:[%s3316_s25 + $0x70] sm:%s2149_s7] }
  0xbf   : > { %488 = vst [vmem:[%s3319_s26 + $0x20] sm:%s2149_s7] %v487_v11  ;;  %v491_v13 = vld [vmem:[%s3316_s25 + $0xa8] sm:%s2149_s7] }
  0xc0   : > { %490 = vst [vmem:[%s3319_s26 + $0x40] sm:%s2149_s7] %v489_v12  ;;  %v493_v14 = vld [vmem:[%s3316_s25 + $0xe0] sm:%s2149_s7] }
  0xc1   : > { %492 = vst [vmem:[%s3319_s26 + $0x60] sm:%s2149_s7] %v491_v13  ;;  %v495_v15 = vld [vmem:[%s3316_s25 + $0x118] sm:%s2149_s7] }
  0xc2   : > { %494 = vst [vmem:[%s3319_s26 + $0x80] sm:%s2149_s7] %v493_v14  ;;  %v497_v16 = vld [vmem:[%s3316_s25 + $0x150] sm:%s2149_s7] }
  0xc3   : > { %496 = vst [vmem:[%s3319_s26 + $0xa0] sm:%s2149_s7] %v495_v15 }
  0xc4   : > { %498 = vst [vmem:[%s3319_s26 + $0xc0] sm:%s2149_s7] %v497_v16 }
  0xc5 PF: > { %p2150_p12 = scmp.ge.u32.totalorder %s3153_s4, 8 }
  0xc6   : > { %s3078_s6 = smov (!%p2150_p12), 1  }
  0xc7   : > { %157 = sbr.rel (%p2150_p12) target bundleno = 212 (0xd4), region = 32  ;;  %s158_s25 = sshll.u32 (!%p2150_p12), %s3078_s6, %s3153_s4 }
  0xc8   : > { %s2151_s26 = sadd.s32 (!%p2150_p12), 4294967295, %s158_s25 }
  0xcc   : > { %v168_v17 = vld [vmem:[%s3151_s29] sm:%s2151_s26]  ;;  %v170_v18 = vld [vmem:[%s3151_s29 + $0x38] sm:%s2151_s26] }
  0xcd   : > { %169 = vst [vmem:[%s3155_s5] sm:%s2151_s26] %v168_v17  ;;  %v172_v19 = vld [vmem:[%s3151_s29 + $0x70] sm:%s2151_s26] }
  0xce   : > { %171 = vst [vmem:[%s3155_s5 + $0x20] sm:%s2151_s26] %v170_v18  ;;  %v174_v20 = vld [vmem:[%s3151_s29 + $0xa8] sm:%s2151_s26] }
  0xcf   : > { %173 = vst [vmem:[%s3155_s5 + $0x40] sm:%s2151_s26] %v172_v19  ;;  %v176_v21 = vld [vmem:[%s3151_s29 + $0xe0] sm:%s2151_s26] }
  0xd0   : > { %175 = vst [vmem:[%s3155_s5 + $0x60] sm:%s2151_s26] %v174_v20  ;;  %v178_v22 = vld [vmem:[%s3151_s29 + $0x118] sm:%s2151_s26] }
  0xd1   : > { %177 = vst [vmem:[%s3155_s5 + $0x80] sm:%s2151_s26] %v176_v21  ;;  %v180_v23 = vld [vmem:[%s3151_s29 + $0x150] sm:%s2151_s26] }
  0xd2   : > { %179 = vst [vmem:[%s3155_s5 + $0xa0] sm:%s2151_s26] %v178_v22 }
  0xd3   : > { %181 = vst [vmem:[%s3155_s5 + $0xc0] sm:%s2151_s26] %v180_v23 }
  0xd4 PF: > { %502 = sbr.rel (!%p3134_p4) target bundleno = 409 (0x199), region = 86  ;;  %s504_s4 = sand.u32 (%p3134_p4), 1, %s2879_s13  }
  0xd5   : > { %s2152_s23 = sshll.u32 (%p3134_p4), %s2883_s14, 2  ;;  %s2203_s27 = smul.u32 (%p3134_p4), 224, %s504_s4 }
  0xd6   : > { %s508_s18 = ssub.s32 (%p3134_p4), 7, %s2152_s23  ;;  %s2200_s28 = sshll.u32 (%p3134_p4), %s2883_s14, 5 }
  0xd7   : > { %p509_p13 = scmp.lt.s32.totalorder (%p3134_p4), %s508_s18, 4  ;;  %s3506_s29 = scalar_lea.vmem (%p3134_p4), %s4684_s1, %s2200_s28  }
  0xd8   : > { %s3510_s20 = scalar_lea.vmem (%p3134_p4), [#allocation3], %s2203_s27  }
  0xd9   : > { %s4759_s18 = smov (!%p509_p13, %s508_s18), 4 }
  0xda   : > { %s511_s5 = smul.u32 56, %s4759_s18  ;;  %s3508_s24 = sshll.u32 %s4759_s18, 3 }
  0xdc   : > { %p2156_p4 = scmp.eq.s32.totalorder %s511_s5, 0 }
  0xdd   : > { %p519_p0 = scmp.lt.u32.totalorder (!%p2156_p4), %s3508_s24, 8 }
  0xde   : > { %518 = sbr.rel (%p2156_p4) target bundleno = 409 (0x199), region = 90 }
  0xe3   : > { %522 = sbr.rel (%p519_p0) target bundleno = 394 (0x18a), region = 94  ;;  %s3514_s30 = sand.u32 (!%p519_p0), 7, %s3508_s24  }
  0xe4   : > { %p551_p1 = scmp.eq.s32.totalorder (!%p519_p0), %s3514_s30, 0  ;;  %p2157_p2 = scmp.ne.s32.totalorder (!%p519_p0), %s3514_s30, 0 }
  0xe8   : > { %554 = sbr.rel (%p2157_p2) target bundleno = 307 (0x133), region = 109  ;;  %s555_s11 = sshrl.u32 (!%p2157_p2), %s3508_s24, 3 }
  0xe9   : > { %2637 = sdivrem.u32 (!%p2157_p2), %s555_s11, 6 }
  0xf2   : > { %s3521_s17 = spop.drf %2637 }
  0xf3   : > { %s2639_s8 = spop.drf %2637  ;;  %p2158_p3 = scmp.le.s32.totalorder %s3521_s17, 0 }
  0xf4   : > { %s4707_s22 = smov (!%p2158_p3), %s3510_s20  ;;  %s4708_s7 = smov (!%p2158_p3), %s3506_s29 }
  0xf5   : > { %1988 = sbr.rel (%p2158_p3) target bundleno = 281 (0x119), region = 368  ;;  %s3530_s6 = smov (!%p2158_p3), 0  }
  0xf6   : > { %s3532_s25 = smov (!%p2158_p3), 0  }
  0xfa LB: >> { %v567_v24 = vld [vmem:[%s2955_s7] sm:$0xff]  ;;  %v569_v25 = vld [vmem:[%s2955_s7 + $0x8] sm:$0xff]  ;;  %v571_v26 = vld [vmem:[%s2955_s7 + $0x10] sm:$0xff]  ;;  %s651_s26 = sadd.s32 1, %s2959_s6  ;;  %s561_s25 = sadd.s32 1, %s2963_s25   ;;  %s2963_s25 = sphi %s3532_s25, %s561_s25   ;;  %s2959_s6 = sphi %s3530_s6, %s4711_s6   ;;  %s2955_s7 = sphi %s4708_s7, %s4710_s7   ;;  %s2951_s22 = sphi %s4707_s22, %s4709_s22  }
  0xfb   : >> { %568 = vst [vmem:[%s2951_s22] sm:$0xff] %v567_v24  ;;  %v573_v27 = vld [vmem:[%s2955_s7 + $0x18] sm:$0xff]  ;;  %v581_v29 = vld [vmem:[%s2955_s7 + $0x40] sm:$0xff]  ;;  %p652_p6 = scmp.ge.s32.totalorder %s651_s26, %s3521_s17  ;;  %v583_v30 = vld [vmem:[%s2955_s7 + $0x48] sm:$0xff]  ;;  %p560_p7 = scmp.ge.s32.totalorder %s561_s25, %s3521_s17 }
  0xfc   : >> { %570 = vst [vmem:[%s2951_s22 + $0x8] sm:$0xff] %v569_v25  ;;  %v579_v28 = vld [vmem:[%s2955_s7 + $0x38] sm:$0xff]  ;;  %v585_v31 = vld [vmem:[%s2955_s7 + $0x50] sm:$0xff]  ;;  %v595_v34 = vld [vmem:[%s2955_s7 + $0x80] sm:$0xff] }
  0xfd   : >> { %572 = vst [vmem:[%s2951_s22 + $0x10] sm:$0xff] %v571_v26  ;;  %s4761_s26 = smov (%p652_p6, %s651_s26), 0  ;;  %v591_v32 = vld [vmem:[%s2955_s7 + $0x70] sm:$0xff]  ;;  %v593_v33 = vld [vmem:[%s2955_s7 + $0x78] sm:$0xff]  ;;  %v597_v35 = vld [vmem:[%s2955_s7 + $0x88] sm:$0xff] }
  0xfe   : >> { %574 = vst [vmem:[%s2951_s22 + $0x18] sm:$0xff] %v573_v27  ;;  %s654_s4 = smul.u32 48, %s4761_s26  ;;  %v603_v36 = vld [vmem:[%s2955_s7 + $0xa8] sm:$0xff]  ;;  %v605_v37 = vld [vmem:[%s2955_s7 + $0xb0] sm:$0xff]  ;;  %v607_v38 = vld [vmem:[%s2955_s7 + $0xb8] sm:$0xff]  ;;  %s4711_s6 = smov %s4761_s26 }
  0xff   : >> { %580 = vst [vmem:[%s2951_s22 + $0x20] sm:$0xff] %v579_v28  ;;  %v609_v39 = vld [vmem:[%s2955_s7 + $0xc0] sm:$0xff]  ;;  %v617_v41 = vld [vmem:[%s2955_s7 + $0xe8] sm:$0xff]  ;;  %v619_v42 = vld [vmem:[%s2955_s7 + $0xf0] sm:$0xff] }
 0x100   : >> { %582 = vst [vmem:[%s2951_s22 + $0x28] sm:$0xff] %v581_v29  ;;  %s3570_s23 = scalar_lea.vmem %s3506_s29, %s654_s4   ;;  %s3573_s27 = scalar_lea.vmem %s3510_s20, %s654_s4 [#allocation3]   ;;  %v615_v40 = vld [vmem:[%s2955_s7 + $0xe0] sm:$0xff]  ;;  %v621_v43 = vld [vmem:[%s2955_s7 + $0xf8] sm:$0xff]  ;;  %v631_v46 = vld [vmem:[%s2955_s7 + $0x128] sm:$0xff] }
 0x101   : >> { %584 = vst [vmem:[%s2951_s22 + $0x30] sm:$0xff] %v583_v30  ;;  %v627_v44 = vld [vmem:[%s2955_s7 + $0x118] sm:$0xff]  ;;  %v629_v45 = vld [vmem:[%s2955_s7 + $0x120] sm:$0xff]  ;;  %v633_v47 = vld [vmem:[%s2955_s7 + $0x130] sm:$0xff] }
 0x102   : >> { %586 = vst [vmem:[%s2951_s22 + $0x38] sm:$0xff] %v585_v31  ;;  %v639_v48 = vld [vmem:[%s2955_s7 + $0x150] sm:$0xff]  ;;  %v641_v49 = vld [vmem:[%s2955_s7 + $0x158] sm:$0xff]  ;;  %v643_v50 = vld [vmem:[%s2955_s7 + $0x160] sm:$0xff] }
 0x103   : >> { %592 = vst [vmem:[%s2951_s22 + $0x40] sm:$0xff] %v591_v32  ;;  %v645_v51 = vld [vmem:[%s2955_s7 + $0x168] sm:$0xff]  ;;  %v647_v52 = vld [vmem:[%s2955_s7 + $0x170] sm:$0xff]  ;;  %v649_v53 = vld [vmem:[%s2955_s7 + $0x178] sm:$0xff]  ;;  %s4710_s7 = smov %s3570_s23 }
 0x104   : >> { %594 = vst [vmem:[%s2951_s22 + $0x48] sm:$0xff] %v593_v33 }
 0x105   : >> { %596 = vst [vmem:[%s2951_s22 + $0x50] sm:$0xff] %v595_v34 }
 0x106   : >> { %598 = vst [vmem:[%s2951_s22 + $0x58] sm:$0xff] %v597_v35 }
 0x107   : >> { %604 = vst [vmem:[%s2951_s22 + $0x60] sm:$0xff] %v603_v36 }
 0x108   : >> { %606 = vst [vmem:[%s2951_s22 + $0x68] sm:$0xff] %v605_v37 }
 0x109   : >> { %608 = vst [vmem:[%s2951_s22 + $0x70] sm:$0xff] %v607_v38 }
 0x10a   : >> { %610 = vst [vmem:[%s2951_s22 + $0x78] sm:$0xff] %v609_v39 }
 0x10b   : >> { %616 = vst [vmem:[%s2951_s22 + $0x80] sm:$0xff] %v615_v40 }
 0x10c   : >> { %618 = vst [vmem:[%s2951_s22 + $0x88] sm:$0xff] %v617_v41 }
 0x10d   : >> { %620 = vst [vmem:[%s2951_s22 + $0x90] sm:$0xff] %v619_v42 }
 0x10e   : >> { %622 = vst [vmem:[%s2951_s22 + $0x98] sm:$0xff] %v621_v43 }
 0x10f   : >> { %628 = vst [vmem:[%s2951_s22 + $0xa0] sm:$0xff] %v627_v44 }
 0x110   : >> { %630 = vst [vmem:[%s2951_s22 + $0xa8] sm:$0xff] %v629_v45 }
 0x111   : >> { %632 = vst [vmem:[%s2951_s22 + $0xb0] sm:$0xff] %v631_v46 }
 0x112   : >> { %634 = vst [vmem:[%s2951_s22 + $0xb8] sm:$0xff] %v633_v47 }
 0x113   : >> { %640 = vst [vmem:[%s2951_s22 + $0xc0] sm:$0xff] %v639_v48 }
 0x114   : >> { %642 = vst [vmem:[%s2951_s22 + $0xc8] sm:$0xff] %v641_v49  ;;  %563 = sbr.rel (!%p560_p7) target bundleno = 250 (0xfa), region = 374 }
 0x115   : >> { %644 = vst [vmem:[%s2951_s22 + $0xd0] sm:$0xff] %v643_v50 }
 0x116   : >> { %646 = vst [vmem:[%s2951_s22 + $0xd8] sm:$0xff] %v645_v51 }
 0x117   : >> { %648 = vst [vmem:[%s2951_s22 + $0xe0] sm:$0xff] %v647_v52 }
 0x118   : >> { %650 = vst [vmem:[%s2951_s22 + $0xe8] sm:$0xff] %v649_v53  ;;  %s4709_s22 = smov %s3573_s27 }
 0x119 PF: > { %2640 = sdivrem.u32 %s555_s11, 6 }
 0x11a   : > { %s2159_s18 = smul.u32 48, %s3521_s17 }
 0x11c   : > { %s3631_s28 = scalar_lea.vmem %s3506_s29, %s2159_s18   ;;  %s3634_s9 = scalar_lea.vmem %s3510_s20, %s2159_s18 [#allocation3]  }
 0x122   : > { %s2641_s10 = spop.drf %2640 }
 0x123   : > { %s3636_s5 = spop.drf %2640 }
 0x124   : > { %p2161_p8 = scmp.le.s32.totalorder %s3636_s5, 0 }
 0x125   : > { %s4712_s8 = smov (!%p2161_p8), %s3634_s9  ;;  %s4713_s22 = smov (!%p2161_p8), %s3631_s28 }
 0x126   : > { %2002 = sbr.rel (%p2161_p8) target bundleno = 307 (0x133), region = 379  ;;  %s3645_s7 = smov (!%p2161_p8), 0  }
 0x127   : > { %s3647_s11 = smov (!%p2161_p8), 0  }
 0x12b LB: >> { %v674_v54 = vld [vmem:[%s2971_s22] sm:$0xff]  ;;  %v676_v55 = vld [vmem:[%s2971_s22 + $0x38] sm:$0xff]  ;;  %v678_v56 = vld [vmem:[%s2971_s22 + $0x70] sm:$0xff]  ;;  %s688_s17 = sadd.s32 1, %s2975_s7  ;;  %s668_s11 = sadd.s32 1, %s2979_s11   ;;  %s2979_s11 = sphi %s3647_s11, %s668_s11   ;;  %s2975_s7 = sphi %s3645_s7, %s4715_s7   ;;  %s2971_s22 = sphi %s4713_s22, %s693_s22   ;;  %s2967_s8 = sphi %s4712_s8, %s4714_s8  }
 0x12c   : >> { %675 = vst [vmem:[%s2967_s8] sm:$0xff] %v674_v54  ;;  %v680_v57 = vld [vmem:[%s2971_s22 + $0xa8] sm:$0xff]  ;;  %p689_p9 = scmp.ge.s32.totalorder %s688_s17, %s3636_s5  ;;  %v682_v58 = vld [vmem:[%s2971_s22 + $0xe0] sm:$0xff]  ;;  %v684_v59 = vld [vmem:[%s2971_s22 + $0x118] sm:$0xff]  ;;  %p667_p10 = scmp.ge.s32.totalorder %s668_s11, %s3636_s5 }
 0x12d   : >> { %677 = vst [vmem:[%s2967_s8 + $0x20] sm:$0xff] %v676_v55  ;;  %v686_v60 = vld [vmem:[%s2971_s22 + $0x150] sm:$0xff] }
 0x12e   : >> { %679 = vst [vmem:[%s2967_s8 + $0x40] sm:$0xff] %v678_v56  ;;  %s4763_s17 = smov (%p689_p9, %s688_s17), 0  ;;  %670 = sbr.rel (!%p667_p10) target bundleno = 299 (0x12b), region = 385 }
 0x12f   : >> { %681 = vst [vmem:[%s2967_s8 + $0x60] sm:$0xff] %v680_v57  ;;  %s2162_s6 = sshll.u32 %s4763_s17, 3  ;;  %s4715_s7 = smov %s4763_s17 }
 0x130   : >> { %683 = vst [vmem:[%s2967_s8 + $0x80] sm:$0xff] %v682_v58  ;;  %s693_s22 = scalar_lea.vmem %s3631_s28, %s2162_s6   ;;  %s694_s25 = scalar_lea.vmem %s3634_s9, %s2162_s6 [#allocation3]  }
 0x131   : >> { %685 = vst [vmem:[%s2967_s8 + $0xa0] sm:$0xff] %v684_v59 }
 0x132   : >> { %687 = vst [vmem:[%s2967_s8 + $0xc0] sm:$0xff] %v686_v60  ;;  %s4714_s8 = smov %s694_s25 }
 0x133 PF: > { %697 = sbr.rel (%p551_p1) target bundleno = 394 (0x18a), region = 127  ;;  %s699_s26 = ssub.s32 (!%p551_p1), %s3508_s24, %s3514_s30 }
 0x134   : > { %s703_s4 = sshrl.u32 (!%p551_p1), %s3508_s24, 3  ;;  %s3671_s23 = scalar_lea.vmem (!%p551_p1), %s3506_s29, %s699_s26 }
 0x135   : > { %s3674_s27 = scalar_lea.vmem (!%p551_p1), %s3510_s20, %s699_s26 [#allocation3]  ;;  %2643 = sdivrem.u32 (!%p551_p1), %s703_s4, 6 }
 0x13e   : > { %s3678_s18 = spop.drf %2643 }
 0x13f   : > { %s2645_s28 = spop.drf %2643  ;;  %p2164_p11 = scmp.le.s32.totalorder %s3678_s18, 0 }
 0x140   : > { %s4716_s9 = smov (!%p2164_p11), %s3510_s20  ;;  %s4717_s10 = smov (!%p2164_p11), %s3506_s29 }
 0x141   : > { %2016 = sbr.rel (%p2164_p11) target bundleno = 357 (0x165), region = 390  ;;  %s3687_s5 = smov (!%p2164_p11), 0  }
 0x142   : > { %s3689_s8 = smov (!%p2164_p11), 0  }
 0x146 LB: >> { %v715_v61 = vld [vmem:[%s2987_s10] sm:$0xff]  ;;  %v717_v62 = vld [vmem:[%s2987_s10 + $0x8] sm:$0xff]  ;;  %v719_v63 = vld [vmem:[%s2987_s10 + $0x10] sm:$0xff]  ;;  %s799_s22 = sadd.s32 1, %s2991_s5  ;;  %s709_s8 = sadd.s32 1, %s2995_s8   ;;  %s2995_s8 = sphi %s3689_s8, %s709_s8   ;;  %s2991_s5 = sphi %s3687_s5, %s4720_s5   ;;  %s2987_s10 = sphi %s4717_s10, %s4719_s10   ;;  %s2983_s9 = sphi %s4716_s9, %s4718_s9  }
 0x147   : >> { %716 = vst [vmem:[%s2983_s9] sm:$0xff] %v715_v61  ;;  %v721_v0 = vld [vmem:[%s2987_s10 + $0x18] sm:$0xff]  ;;  %v729_v2 = vld [vmem:[%s2987_s10 + $0x40] sm:$0xff]  ;;  %p800_p12 = scmp.ge.s32.totalorder %s799_s22, %s3678_s18  ;;  %v731_v3 = vld [vmem:[%s2987_s10 + $0x48] sm:$0xff]  ;;  %p708_p13 = scmp.ge.s32.totalorder %s709_s8, %s3678_s18 }
 0x148   : >> { %718 = vst [vmem:[%s2983_s9 + $0x8] sm:$0xff] %v717_v62  ;;  %v727_v1 = vld [vmem:[%s2987_s10 + $0x38] sm:$0xff]  ;;  %v733_v4 = vld [vmem:[%s2987_s10 + $0x50] sm:$0xff]  ;;  %v743_v7 = vld [vmem:[%s2987_s10 + $0x80] sm:$0xff] }
 0x149   : >> { %720 = vst [vmem:[%s2983_s9 + $0x10] sm:$0xff] %v719_v63  ;;  %s4765_s22 = smov (%p800_p12, %s799_s22), 0  ;;  %v739_v5 = vld [vmem:[%s2987_s10 + $0x70] sm:$0xff]  ;;  %v741_v6 = vld [vmem:[%s2987_s10 + $0x78] sm:$0xff]  ;;  %v745_v8 = vld [vmem:[%s2987_s10 + $0x88] sm:$0xff] }
 0x14a   : >> { %722 = vst [vmem:[%s2983_s9 + $0x18] sm:$0xff] %v721_v0  ;;  %s802_s7 = smul.u32 48, %s4765_s22  ;;  %v751_v9 = vld [vmem:[%s2987_s10 + $0xa8] sm:$0xff]  ;;  %v753_v10 = vld [vmem:[%s2987_s10 + $0xb0] sm:$0xff]  ;;  %v755_v11 = vld [vmem:[%s2987_s10 + $0xb8] sm:$0xff]  ;;  %s4720_s5 = smov %s4765_s22 }
 0x14b   : >> { %728 = vst [vmem:[%s2983_s9 + $0x20] sm:$0xff] %v727_v1  ;;  %v757_v12 = vld [vmem:[%s2987_s10 + $0xc0] sm:$0xff]  ;;  %v765_v14 = vld [vmem:[%s2987_s10 + $0xe8] sm:$0xff]  ;;  %v767_v15 = vld [vmem:[%s2987_s10 + $0xf0] sm:$0xff] }
 0x14c   : >> { %730 = vst [vmem:[%s2983_s9 + $0x28] sm:$0xff] %v729_v2  ;;  %s3727_s11 = scalar_lea.vmem %s3506_s29, %s802_s7   ;;  %s3730_s17 = scalar_lea.vmem %s3510_s20, %s802_s7 [#allocation3]   ;;  %v763_v13 = vld [vmem:[%s2987_s10 + $0xe0] sm:$0xff]  ;;  %v769_v16 = vld [vmem:[%s2987_s10 + $0xf8] sm:$0xff]  ;;  %v779_v19 = vld [vmem:[%s2987_s10 + $0x128] sm:$0xff] }
 0x14d   : >> { %732 = vst [vmem:[%s2983_s9 + $0x30] sm:$0xff] %v731_v3  ;;  %v775_v17 = vld [vmem:[%s2987_s10 + $0x118] sm:$0xff]  ;;  %v777_v18 = vld [vmem:[%s2987_s10 + $0x120] sm:$0xff]  ;;  %v781_v20 = vld [vmem:[%s2987_s10 + $0x130] sm:$0xff] }
 0x14e   : >> { %734 = vst [vmem:[%s2983_s9 + $0x38] sm:$0xff] %v733_v4  ;;  %v787_v21 = vld [vmem:[%s2987_s10 + $0x150] sm:$0xff]  ;;  %v789_v22 = vld [vmem:[%s2987_s10 + $0x158] sm:$0xff]  ;;  %v791_v23 = vld [vmem:[%s2987_s10 + $0x160] sm:$0xff] }
 0x14f   : >> { %740 = vst [vmem:[%s2983_s9 + $0x40] sm:$0xff] %v739_v5  ;;  %v793_v24 = vld [vmem:[%s2987_s10 + $0x168] sm:$0xff]  ;;  %v795_v25 = vld [vmem:[%s2987_s10 + $0x170] sm:$0xff]  ;;  %v797_v26 = vld [vmem:[%s2987_s10 + $0x178] sm:$0xff]  ;;  %s4719_s10 = smov %s3727_s11 }
 0x150   : >> { %742 = vst [vmem:[%s2983_s9 + $0x48] sm:$0xff] %v741_v6 }
 0x151   : >> { %744 = vst [vmem:[%s2983_s9 + $0x50] sm:$0xff] %v743_v7 }
 0x152   : >> { %746 = vst [vmem:[%s2983_s9 + $0x58] sm:$0xff] %v745_v8 }
 0x153   : >> { %752 = vst [vmem:[%s2983_s9 + $0x60] sm:$0xff] %v751_v9 }
 0x154   : >> { %754 = vst [vmem:[%s2983_s9 + $0x68] sm:$0xff] %v753_v10 }
 0x155   : >> { %756 = vst [vmem:[%s2983_s9 + $0x70] sm:$0xff] %v755_v11 }
 0x156   : >> { %758 = vst [vmem:[%s2983_s9 + $0x78] sm:$0xff] %v757_v12 }
 0x157   : >> { %764 = vst [vmem:[%s2983_s9 + $0x80] sm:$0xff] %v763_v13 }
 0x158   : >> { %766 = vst [vmem:[%s2983_s9 + $0x88] sm:$0xff] %v765_v14 }
 0x159   : >> { %768 = vst [vmem:[%s2983_s9 + $0x90] sm:$0xff] %v767_v15 }
 0x15a   : >> { %770 = vst [vmem:[%s2983_s9 + $0x98] sm:$0xff] %v769_v16 }
 0x15b   : >> { %776 = vst [vmem:[%s2983_s9 + $0xa0] sm:$0xff] %v775_v17 }
 0x15c   : >> { %778 = vst [vmem:[%s2983_s9 + $0xa8] sm:$0xff] %v777_v18 }
 0x15d   : >> { %780 = vst [vmem:[%s2983_s9 + $0xb0] sm:$0xff] %v779_v19 }
 0x15e   : >> { %782 = vst [vmem:[%s2983_s9 + $0xb8] sm:$0xff] %v781_v20 }
 0x15f   : >> { %788 = vst [vmem:[%s2983_s9 + $0xc0] sm:$0xff] %v787_v21 }
 0x160   : >> { %790 = vst [vmem:[%s2983_s9 + $0xc8] sm:$0xff] %v789_v22  ;;  %711 = sbr.rel (!%p708_p13) target bundleno = 326 (0x146), region = 396 }
 0x161   : >> { %792 = vst [vmem:[%s2983_s9 + $0xd0] sm:$0xff] %v791_v23 }
 0x162   : >> { %794 = vst [vmem:[%s2983_s9 + $0xd8] sm:$0xff] %v793_v24 }
 0x163   : >> { %796 = vst [vmem:[%s2983_s9 + $0xe0] sm:$0xff] %v795_v25 }
 0x164   : >> { %798 = vst [vmem:[%s2983_s9 + $0xe8] sm:$0xff] %v797_v26  ;;  %s4718_s9 = smov %s3730_s17 }
 0x165 PF: > { %2646 = sdivrem.u32 %s703_s4, 6 }
 0x166   : > { %s2165_s6 = smul.u32 48, %s3678_s18 }
 0x168   : > { %s3788_s25 = scalar_lea.vmem %s3506_s29, %s2165_s6   ;;  %s3791_s26 = scalar_lea.vmem %s3510_s20, %s2165_s6 [#allocation3]  }
 0x16e   : > { %s2647_s28 = spop.drf %2646 }
 0x16f   : > { %s3793_s7 = spop.drf %2646 }
 0x170   : > { %p2167_p4 = scmp.le.s32.totalorder %s3793_s7, 0 }
 0x171   : > { %s4721_s9 = smov (!%p2167_p4), %s3791_s26  ;;  %s4722_s10 = smov (!%p2167_p4), %s3788_s25 }
 0x172   : > { %2030 = sbr.rel (%p2167_p4) target bundleno = 383 (0x17f), region = 401  ;;  %s3802_s5 = smov (!%p2167_p4), 0  }
 0x173   : > { %s3804_s4 = smov (!%p2167_p4), 0  }
 0x177 LB: >> { %v822_v27 = vld [vmem:[%s3003_s10] sm:$0xff]  ;;  %v824_v28 = vld [vmem:[%s3003_s10 + $0x38] sm:$0xff]  ;;  %v826_v29 = vld [vmem:[%s3003_s10 + $0x70] sm:$0xff]  ;;  %s836_s18 = sadd.s32 1, %s3007_s5  ;;  %s816_s4 = sadd.s32 1, %s3011_s4   ;;  %s3011_s4 = sphi %s3804_s4, %s816_s4   ;;  %s3007_s5 = sphi %s3802_s5, %s4724_s5   ;;  %s3003_s10 = sphi %s4722_s10, %s841_s10   ;;  %s2999_s9 = sphi %s4721_s9, %s4723_s9  }
 0x178   : >> { %823 = vst [vmem:[%s2999_s9] sm:$0xff] %v822_v27  ;;  %v828_v30 = vld [vmem:[%s3003_s10 + $0xa8] sm:$0xff]  ;;  %p837_p0 = scmp.ge.s32.totalorder %s836_s18, %s3793_s7  ;;  %v830_v31 = vld [vmem:[%s3003_s10 + $0xe0] sm:$0xff]  ;;  %v832_v32 = vld [vmem:[%s3003_s10 + $0x118] sm:$0xff]  ;;  %p815_p1 = scmp.ge.s32.totalorder %s816_s4, %s3793_s7 }
 0x179   : >> { %825 = vst [vmem:[%s2999_s9 + $0x20] sm:$0xff] %v824_v28  ;;  %v834_v33 = vld [vmem:[%s3003_s10 + $0x150] sm:$0xff] }
 0x17a   : >> { %827 = vst [vmem:[%s2999_s9 + $0x40] sm:$0xff] %v826_v29  ;;  %s4767_s18 = smov (%p837_p0, %s836_s18), 0  ;;  %818 = sbr.rel (!%p815_p1) target bundleno = 375 (0x177), region = 407 }
 0x17b   : >> { %829 = vst [vmem:[%s2999_s9 + $0x60] sm:$0xff] %v828_v30  ;;  %s2168_s8 = sshll.u32 %s4767_s18, 3  ;;  %s4724_s5 = smov %s4767_s18 }
 0x17c   : >> { %831 = vst [vmem:[%s2999_s9 + $0x80] sm:$0xff] %v830_v31  ;;  %s841_s10 = scalar_lea.vmem %s3788_s25, %s2168_s8   ;;  %s842_s22 = scalar_lea.vmem %s3791_s26, %s2168_s8 [#allocation3]  }
 0x17d   : >> { %833 = vst [vmem:[%s2999_s9 + $0xa0] sm:$0xff] %v832_v32 }
 0x17e   : >> { %835 = vst [vmem:[%s2999_s9 + $0xc0] sm:$0xff] %v834_v33  ;;  %s4723_s9 = smov %s842_s22 }
 0x17f PF: > { %s3079_s11 = smov 1  }
 0x180   : > { %s843_s17 = sshll.u32 %s3079_s11, %s3514_s30 }
 0x181   : > { %s2170_s6 = sadd.s32 4294967295, %s843_s17 }
 0x182   : > { %v853_v34 = vld [vmem:[%s3671_s23] sm:%s2170_s6]  ;;  %v855_v35 = vld [vmem:[%s3671_s23 + $0x38] sm:%s2170_s6] }
 0x183   : > { %854 = vst [vmem:[%s3674_s27] sm:%s2170_s6] %v853_v34  ;;  %v857_v36 = vld [vmem:[%s3671_s23 + $0x70] sm:%s2170_s6] }
 0x184   : > { %856 = vst [vmem:[%s3674_s27 + $0x20] sm:%s2170_s6] %v855_v35  ;;  %v859_v37 = vld [vmem:[%s3671_s23 + $0xa8] sm:%s2170_s6] }
 0x185   : > { %858 = vst [vmem:[%s3674_s27 + $0x40] sm:%s2170_s6] %v857_v36  ;;  %v861_v38 = vld [vmem:[%s3671_s23 + $0xe0] sm:%s2170_s6] }
 0x186   : > { %860 = vst [vmem:[%s3674_s27 + $0x60] sm:%s2170_s6] %v859_v37  ;;  %v863_v39 = vld [vmem:[%s3671_s23 + $0x118] sm:%s2170_s6] }
 0x187   : > { %862 = vst [vmem:[%s3674_s27 + $0x80] sm:%s2170_s6] %v861_v38  ;;  %v865_v40 = vld [vmem:[%s3671_s23 + $0x150] sm:%s2170_s6] }
 0x188   : > { %864 = vst [vmem:[%s3674_s27 + $0xa0] sm:%s2170_s6] %v863_v39 }
 0x189   : > { %866 = vst [vmem:[%s3674_s27 + $0xc0] sm:%s2170_s6] %v865_v40 }
 0x18a PF: > { %p2171_p2 = scmp.ge.u32.totalorder %s3508_s24, 8 }
 0x18b   : > { %s3080_s30 = smov (!%p2171_p2), 1  }
 0x18c   : > { %525 = sbr.rel (%p2171_p2) target bundleno = 409 (0x199), region = 98  ;;  %s526_s23 = sshll.u32 (!%p2171_p2), %s3080_s30, %s3508_s24 }
 0x18d   : > { %s2172_s27 = sadd.s32 (!%p2171_p2), 4294967295, %s526_s23 }
 0x191   : > { %v536_v41 = vld [vmem:[%s3506_s29] sm:%s2172_s27]  ;;  %v538_v42 = vld [vmem:[%s3506_s29 + $0x38] sm:%s2172_s27] }
 0x192   : > { %537 = vst [vmem:[%s3510_s20] sm:%s2172_s27] %v536_v41  ;;  %v540_v43 = vld [vmem:[%s3506_s29 + $0x70] sm:%s2172_s27] }
 0x193   : > { %539 = vst [vmem:[%s3510_s20 + $0x20] sm:%s2172_s27] %v538_v42  ;;  %v542_v44 = vld [vmem:[%s3506_s29 + $0xa8] sm:%s2172_s27] }
 0x194   : > { %541 = vst [vmem:[%s3510_s20 + $0x40] sm:%s2172_s27] %v540_v43  ;;  %v544_v45 = vld [vmem:[%s3506_s29 + $0xe0] sm:%s2172_s27] }
 0x195   : > { %543 = vst [vmem:[%s3510_s20 + $0x60] sm:%s2172_s27] %v542_v44  ;;  %v546_v46 = vld [vmem:[%s3506_s29 + $0x118] sm:%s2172_s27] }
 0x196   : > { %545 = vst [vmem:[%s3510_s20 + $0x80] sm:%s2172_s27] %v544_v45  ;;  %v548_v47 = vld [vmem:[%s3506_s29 + $0x150] sm:%s2172_s27] }
 0x197   : > { %547 = vst [vmem:[%s3510_s20 + $0xa0] sm:%s2172_s27] %v546_v46 }
 0x198   : > { %549 = vst [vmem:[%s3510_s20 + $0xc0] sm:%s2172_s27] %v548_v47 }
 0x199 PF: > { %p2173_p3 = scmp.ge.s32.totalorder %s2883_s14, 1  ;;  %p886_p6 = scmp.lt.s32.totalorder %s2883_s14, 3 }
 0x19b   : > { %p887_p7 = pnand %p2173_p3, %p886_p6 }
 0x19c   : > { %s893_s24 = sand.u32 (!%p887_p7), 1, %s2875_s12   ;;  %s4122_s12 = sshll.u32 (!%p887_p7), %s3119_s15, 2 }
 0x19d   : > { %890 = sbr.rel (%p887_p7) target bundleno = 768 (0x300), region = 156  ;;  %p950_p8 = scmp.lt.s32.totalorder (!%p887_p7), %s4122_s12, 6 }
 0x19e   : > { %s3856_s25 = smul.u32 (!%p887_p7), 224, %s893_s24 }
 0x1a0   : > { %s3859_s26 = scalar_lea.vmem (!%p887_p7), [#allocation2], %s3856_s25  ;;  %s4154_s9 = scalar_lea.vmem (!%p887_p7), [#allocation3], %s3856_s25 }
 0x1a1   : > { %s4187_s10 = scalar_lea.vmem (!%p887_p7), [#allocation4], %s3856_s25  }
 0x1a2   : > { %v3862_v48 = vld [vmem:[%s3859_s26] sm:$0xff]  ;;  %v3865_v49 = vld [vmem:[%s3859_s26 + $0x8] sm:$0xff]  ;;  %v3868_v50 = vld [vmem:[%s3859_s26 + $0x10] sm:$0xff]  ;;  %vm997_vm0 = vcmask 1040384   ;;  %s951_s14 = scalar_select %p950_p8, %s4122_s12, 6  ;;  %vm1213_vm13 = vcmask 1041408  }
 0x1a3   : > { %v3871_v51 = vld [vmem:[%s3859_s26 + $0x18] sm:$0xff]  ;;  %v3874_v52 = vld [vmem:[%s3859_s26 + $0x20] sm:$0xff]  ;;  %v3877_v53 = vld [vmem:[%s3859_s26 + $0x28] sm:$0xff]  ;;  %vm1215_vm14 = vcmask 1045508   ;;  %vm1217_vm15 = vcmask 1043456   ;;  %s1423_s5 = ssub.s32 (%p3138_p5), 7, %s4122_s12 }
 0x1a4   : > { %v3880_v54 = vld [vmem:[%s3859_s26 + $0x30] sm:$0xff]  ;;  %v3883_v55 = vld [vmem:[%s3859_s26 + $0x38] sm:$0xff]  ;;  %v3886_v56 = vld [vmem:[%s3859_s26 + $0x40] sm:$0xff]  ;;  %v992_v57 = vadd.f32 %v3874_v52, %v3862_v48  ;;  %v1006_v58 = vadd.f32 %v3877_v53, %v3865_v49  ;;  %s2175_s29 = sshll.u32 %s951_s14, 1  ;;  %s2201_s4 = sshll.u32 (%p3138_p5), %s3119_s15, 5 }
 0x1a5   : > { %v3893_v59 = vld [vmem:[%s3859_s26 + $0x48] sm:$0xff]  ;;  %v3896_v60 = vld [vmem:[%s3859_s26 + $0x50] sm:$0xff]  ;;  %v3899_v61 = vld [vmem:[%s3859_s26 + $0x58] sm:$0xff]  ;;  %v1019_v62 = vadd.f32 %v3880_v54, %v3868_v50  ;;  %v1032_v63 = vadd.f32 %v3883_v55, %v3871_v51  ;;  %s953_s7 = scalar_lea.vmem %s4685_s2, %s2175_s29  ;;  %p1424_p9 = scmp.lt.s32.totalorder (%p3138_p5), %s1423_s5, 4 }
 0x1a6   : > { %v3906_v0 = vld [vmem:[%s3859_s26 + $0x60] sm:$0xff]  ;;  %v3909_v1 = vld [vmem:[%s3859_s26 + $0x68] sm:$0xff]  ;;  %v3912_v2 = vld [vmem:[%s3859_s26 + $0x70] sm:$0xff]  ;;  %v993_v3 = vadd.f32 %v992_v57, %v3886_v56  ;;  %v1007_v4 = vadd.f32 %v1006_v58, %v3893_v59  ;;  %s4304_s22 = scalar_lea.vmem (%p3138_p5), %s4686_s3, %s2201_s4  }
 0x1a7   : > { %v3917_v5 = vld [vmem:[%s3859_s26 + $0x78] sm:$0xff]  ;;  %v3920_v6 = vld [vmem:[%s3859_s26 + $0x80] sm:$0xff]  ;;  %v3923_v7 = vld [vmem:[%s3859_s26 + $0x88] sm:$0xff]  ;;  %v1020_v8 = vadd.f32 %v1019_v62, %v3896_v60  ;;  %v1033_v9 = vadd.f32 %v1032_v63, %v3899_v61 }
 0x1a8   : > { %v3928_v10 = vld [vmem:[%s3859_s26 + $0x90] sm:$0xff]  ;;  %v3931_v11 = vld [vmem:[%s3859_s26 + $0x98] sm:$0xff]  ;;  %v994_v12 = vadd.f32 %v993_v3, %v3906_v0  ;;  %v1008_v13 = vadd.f32 %v1007_v4, %v3909_v1  ;;  %v3936_v14 = vld [vmem:[%s3859_s26 + $0xa0] sm:$0xff] }
 0x1a9   : > { %v3939_v15 = vld [vmem:[%s3859_s26 + $0xa8] sm:$0xff]  ;;  %v3942_v16 = vld [vmem:[%s3859_s26 + $0xb0] sm:$0xff]  ;;  %v1021_v17 = vadd.f32 %v1020_v8, %v3912_v2  ;;  %v1034_v18 = vadd.f32 %v1033_v9, %v3917_v5  ;;  %v3947_v19 = vld [vmem:[%s3859_s26 + $0xc0] sm:$0x1] }
 0x1aa   : > { %v3950_v20 = vld [vmem:[%s3859_s26 + $0xc8] sm:$0x1]  ;;  %v3953_v21 = vld [vmem:[%s3859_s26 + $0xd0] sm:$0x1]  ;;  %v995_v22 = vadd.f32 %v994_v12, %v3920_v6  ;;  %v1009_v23 = vadd.f32 %v1008_v13, %v3923_v7  ;;  %v3958_v24 = vld [vmem:[%s3859_s26 + $0xb8] sm:$0xff]  ;;  %v998_v26 = vsel %vm997_vm0, %v3947_v19, 0.0 }
 0x1ab   : > { %v3961_v25 = vld [vmem:[%s3859_s26 + $0xd8] sm:$0x1]  ;;  %v1011_v27 = vsel %vm997_vm0, %v3950_v20, 0.0  ;;  %v1022_v28 = vadd.f32 %v1021_v17, %v3928_v10  ;;  %v1024_v31 = vsel %vm997_vm0, %v3953_v21, 0.0  ;;  %v1035_v32 = vadd.f32 %v1034_v18, %v3931_v11 }
 0x1ac   : > { %v996_v29 = vadd.f32 %v995_v22, %v3936_v14  ;;  %v1010_v30 = vadd.f32 %v1009_v23, %v3939_v15  ;;  %v1037_v34 = vsel %vm997_vm0, %v3961_v25, 0.0 }
 0x1ad   : > { %v1023_v33 = vadd.f32 %v1022_v28, %v3942_v16  ;;  %v1036_v37 = vadd.f32 %v1035_v32, %v3958_v24 }
 0x1ae   : > { %v999_v35 = vadd.f32 %v998_v26, %v996_v29  ;;  %v1012_v36 = vadd.f32 %v1011_v27, %v1010_v30 }
 0x1af   : > { %v1025_v38 = vadd.f32 %v1024_v31, %v1023_v33  ;;  %v1038_v41 = vadd.f32 %v1037_v34, %v1036_v37 }
 0x1b0   : > { %v1000_v39 = vrot.slane %v999_v35, 4  ;;  %v1013_v40 = vrot.slane %v1012_v36, 4 }
 0x1b1   : > { %v1026_v42 = vrot.slane %v1025_v38, 4  ;;  %v1039_v45 = vrot.slane %v1038_v41, 4 }
 0x1b2   : > { %v1001_v43 = vadd.f32 %v1000_v39, %v999_v35  ;;  %v1014_v44 = vadd.f32 %v1013_v40, %v1012_v36 }
 0x1b3   : > { %v1027_v46 = vadd.f32 %v1026_v42, %v1025_v38  ;;  %v1040_v58 = vadd.f32 %v1039_v45, %v1038_v41 }
 0x1b4   : > { %v1002_v47 = vrot.slane %v1001_v43, 2  ;;  %v1015_v57 = vrot.slane %v1014_v44, 2 }
 0x1b5   : > { %v1028_v62 = vrot.slane %v1027_v46, 2  ;;  %v1041_v4 = vrot.slane %v1040_v58, 2 }
 0x1b6   : > { %v1003_v63 = vadd.f32 %v1002_v47, %v1001_v43  ;;  %v1016_v3 = vadd.f32 %v1015_v57, %v1014_v44 }
 0x1b7   : > { %v1029_v8 = vadd.f32 %v1028_v62, %v1027_v46  ;;  %v1042_v13 = vadd.f32 %v1041_v4, %v1040_v58 }
 0x1b8   : > { %v1004_v9 = vrot.slane %v1003_v63, 1  ;;  %v1017_v12 = vrot.slane %v1016_v3, 1 }
 0x1b9   : > { %v1030_v17 = vrot.slane %v1029_v8, 1  ;;  %v1043_v23 = vrot.slane %v1042_v13, 1 }
 0x1ba   : > { %v1005_v18 = vadd.f32 %v1004_v9, %v1003_v63  ;;  %v1018_v22 = vadd.f32 %v1017_v12, %v1016_v3 }
 0x1bb   : > { %v1031_v26 = vadd.f32 %v1030_v17, %v1029_v8  ;;  %v1044_v27 = vadd.f32 %v1043_v23, %v1042_v13 }
 0x1bc   : > { %v1045_v28 = vmul.f32 0.020408163, %v1005_v18  ;;  %v1046_v29 = vmul.f32 0.020408163, %v1018_v22 }
 0x1bd   : > { %v1047_v30 = vmul.f32 0.020408163, %v1031_v26  ;;  %v1048_v31 = vmul.f32 0.020408163, %v1044_v27 }
 0x1be   : > { %v3978_v32 = vsub.f32 %v3862_v48, %v1045_v28  ;;  %v3981_v33 = vsub.f32 %v3865_v49, %v1046_v29  ;;  %v3987_v35 = vsub.f32 %v3874_v52, %v1045_v28  ;;  %v3990_v36 = vsub.f32 %v3877_v53, %v1046_v29 }
 0x1bf   : > { %v3984_v34 = vsub.f32 %v3868_v50, %v1047_v30  ;;  %v3993_v37 = vsub.f32 %v3880_v54, %v1047_v30  ;;  %v3996_v38 = vsub.f32 %v3871_v51, %v1048_v31  ;;  %v3999_v48 = vsub.f32 %v3883_v55, %v1048_v31 }
 0x1c0   : > { %v4002_v49 = vsub.f32 %v3886_v56, %v1045_v28  ;;  %v4005_v50 = vsub.f32 %v3893_v59, %v1046_v29  ;;  %v4008_v52 = vsub.f32 %v3896_v60, %v1047_v30  ;;  %v4011_v53 = vsub.f32 %v3899_v61, %v1048_v31 }
 0x1c1   : > { %v4014_v54 = vsub.f32 %v3906_v0, %v1045_v28  ;;  %v4017_v51 = vsub.f32 %v3909_v1, %v1046_v29  ;;  %v4020_v55 = vsub.f32 %v3912_v2, %v1047_v30  ;;  %v4023_v56 = vsub.f32 %v3917_v5, %v1048_v31 }
 0x1c2   : > { %v4026_v59 = vsub.f32 %v3920_v6, %v1045_v28  ;;  %v4029_v60 = vsub.f32 %v3923_v7, %v1046_v29  ;;  %v4032_v61 = vsub.f32 %v3928_v10, %v1047_v30  ;;  %v4035_v0 = vsub.f32 %v3931_v11, %v1048_v31 }
 0x1c3   : > { %v4038_v1 = vsub.f32 %v3936_v14, %v1045_v28  ;;  %v4041_v2 = vsub.f32 %v3939_v15, %v1046_v29  ;;  %v4044_v5 = vsub.f32 %v3942_v16, %v1047_v30  ;;  %v4047_v6 = vsub.f32 %v3958_v24, %v1048_v31 }
 0x1c4   : > { %v4050_v7 = vsub.f32 %v3947_v19, %v1045_v28  ;;  %v4053_v10 = vsub.f32 %v3950_v20, %v1046_v29  ;;  %v4056_v11 = vsub.f32 %v3953_v21, %v1047_v30  ;;  %v4059_v14 = vsub.f32 %v3961_v25, %v1048_v31 }
 0x1c5   : > { %v1077_v15 = vmul.f32 %v3978_v32, %v3978_v32  ;;  %v1078_v16 = vmul.f32 %v3981_v33, %v3981_v33  ;;  %v1079_v24 = vmul.f32 %v3984_v34, %v3984_v34  ;;  %v1081_v19 = vmul.f32 %v3987_v35, %v3987_v35 }
 0x1c6   : > { %v1082_v20 = vmul.f32 %v3990_v36, %v3990_v36  ;;  %v1083_v21 = vmul.f32 %v3993_v37, %v3993_v37  ;;  %v1080_v25 = vmul.f32 %v3996_v38, %v3996_v38  ;;  %v1084_v39 = vmul.f32 %v3999_v48, %v3999_v48 }
 0x1c7   : > { %v1085_v40 = vmul.f32 %v4002_v49, %v4002_v49  ;;  %v1086_v41 = vmul.f32 %v4005_v50, %v4005_v50  ;;  %v1087_v42 = vmul.f32 %v4008_v52, %v4008_v52  ;;  %v1088_v43 = vmul.f32 %v4011_v53, %v4011_v53 }
 0x1c8   : > { %v1089_v44 = vmul.f32 %v4014_v54, %v4014_v54  ;;  %v1090_v45 = vmul.f32 %v4017_v51, %v4017_v51  ;;  %v1091_v46 = vmul.f32 %v4020_v55, %v4020_v55  ;;  %v1092_v47 = vmul.f32 %v4023_v56, %v4023_v56 }
 0x1c9   : > { %v1093_v57 = vmul.f32 %v4026_v59, %v4026_v59  ;;  %v1094_v58 = vmul.f32 %v4029_v60, %v4029_v60  ;;  %v1095_v62 = vmul.f32 %v4032_v61, %v4032_v61  ;;  %v1105_v63 = vadd.f32 %v1081_v19, %v1077_v15 }
 0x1ca   : > { %v1118_v3 = vadd.f32 %v1082_v20, %v1078_v16  ;;  %v1131_v4 = vadd.f32 %v1083_v21, %v1079_v24  ;;  %v1096_v8 = vmul.f32 %v4035_v0, %v4035_v0  ;;  %v1097_v9 = vmul.f32 %v4038_v1, %v4038_v1 }
 0x1cb   : > { %v1098_v12 = vmul.f32 %v4041_v2, %v4041_v2  ;;  %v1144_v13 = vadd.f32 %v1084_v39, %v1080_v25  ;;  %v1099_v17 = vmul.f32 %v4044_v5, %v4044_v5  ;;  %v1106_v18 = vadd.f32 %v1105_v63, %v1085_v40 }
 0x1cc   : > { %v1119_v22 = vadd.f32 %v1118_v3, %v1086_v41  ;;  %v1132_v23 = vadd.f32 %v1131_v4, %v1087_v42  ;;  %v1101_v26 = vmul.f32 %v4050_v7, %v4050_v7  ;;  %v1102_v27 = vmul.f32 %v4053_v10, %v4053_v10 }
 0x1cd   : > { %v1103_v28 = vmul.f32 %v4056_v11, %v4056_v11  ;;  %v1145_v29 = vadd.f32 %v1144_v13, %v1088_v43  ;;  %v1104_v30 = vmul.f32 %v4059_v14, %v4059_v14  ;;  %v1107_v31 = vadd.f32 %v1106_v18, %v1089_v44 }
 0x1ce   : > { %v1120_v15 = vadd.f32 %v1119_v22, %v1090_v45  ;;  %v1133_v16 = vadd.f32 %v1132_v23, %v1091_v46  ;;  %v1100_v24 = vmul.f32 %v4047_v6, %v4047_v6  ;;  %v1110_v39 = vsel %vm997_vm0, %v1101_v26, 0.0 }
 0x1cf   : > { %v1146_v19 = vadd.f32 %v1145_v29, %v1092_v47  ;;  %v1108_v20 = vadd.f32 %v1107_v31, %v1093_v57  ;;  %v1123_v40 = vsel %vm997_vm0, %v1102_v27, 0.0  ;;  %v1136_v41 = vsel %vm997_vm0, %v1103_v28, 0.0 }
 0x1d0   : > { %v1121_v21 = vadd.f32 %v1120_v15, %v1094_v58  ;;  %v1134_v25 = vadd.f32 %v1133_v16, %v1095_v62  ;;  %v1149_v44 = vsel %vm997_vm0, %v1104_v30, 0.0 }
 0x1d1   : > { %v1147_v42 = vadd.f32 %v1146_v19, %v1096_v8  ;;  %v1109_v43 = vadd.f32 %v1108_v20, %v1097_v9 }
 0x1d2   : > { %v1122_v63 = vadd.f32 %v1121_v21, %v1098_v12  ;;  %v1135_v3 = vadd.f32 %v1134_v25, %v1099_v17 }
 0x1d3   : > { %v1148_v45 = vadd.f32 %v1147_v42, %v1100_v24  ;;  %v1111_v46 = vadd.f32 %v1110_v39, %v1109_v43 }
 0x1d4   : > { %v1124_v4 = vadd.f32 %v1123_v40, %v1122_v63  ;;  %v1137_v13 = vadd.f32 %v1136_v41, %v1135_v3 }
 0x1d5   : > { %v1150_v47 = vadd.f32 %v1149_v44, %v1148_v45  ;;  %v1112_v57 = vrot.slane %v1111_v46, 4 }
 0x1d6   : > { %v1125_v58 = vrot.slane %v1124_v4, 4  ;;  %v1138_v62 = vrot.slane %v1137_v13, 4 }
 0x1d7   : > { %v1151_v18 = vrot.slane %v1150_v47, 4  ;;  %v1113_v22 = vadd.f32 %v1112_v57, %v1111_v46 }
 0x1d8   : > { %v1126_v23 = vadd.f32 %v1125_v58, %v1124_v4  ;;  %v1139_v26 = vadd.f32 %v1138_v62, %v1137_v13 }
 0x1d9   : > { %v1152_v27 = vadd.f32 %v1151_v18, %v1150_v47  ;;  %v1114_v28 = vrot.slane %v1113_v22, 2 }
 0x1da   : > { %v1127_v8 = vrot.slane %v1126_v23, 2  ;;  %v1140_v9 = vrot.slane %v1139_v26, 2 }
 0x1db   : > { %v1153_v12 = vrot.slane %v1152_v27, 2  ;;  %v1115_v17 = vadd.f32 %v1114_v28, %v1113_v22 }
 0x1dc   : > { %v1128_v29 = vadd.f32 %v1127_v8, %v1126_v23  ;;  %v1141_v30 = vadd.f32 %v1140_v9, %v1139_v26 }
 0x1dd   : > { %v1154_v31 = vadd.f32 %v1153_v12, %v1152_v27  ;;  %v1116_v15 = vrot.slane %v1115_v17, 1 }
 0x1de   : > { %v1129_v16 = vrot.slane %v1128_v29, 1  ;;  %v1142_v24 = vrot.slane %v1141_v30, 1 }
 0x1df   : > { %v1155_v19 = vrot.slane %v1154_v31, 1  ;;  %v1117_v20 = vadd.f32 %v1116_v15, %v1115_v17 }
 0x1e0   : > { %v1130_v21 = vadd.f32 %v1129_v16, %v1128_v29  ;;  %v1143_v25 = vadd.f32 %v1142_v24, %v1141_v30 }
 0x1e1   : > { %v1156_v39 = vadd.f32 %v1155_v19, %v1154_v31  ;;  %v1157_v40 = vmul.f32 0.020408163, %v1117_v20 }
 0x1e2   : > { %v1158_v41 = vmul.f32 0.020408163, %v1130_v21  ;;  %v1159_v42 = vmul.f32 0.020408163, %v1143_v25 }
 0x1e3   : > { %v1160_v43 = vmul.f32 0.020408163, %v1156_v39  ;;  %v1161_v63 = vadd.f32 1e-05, %v1157_v40 }
 0x1e4   : > { %v1162_v3 = vadd.f32 1e-05, %v1158_v41  ;;  %v1163_v44 = vadd.f32 1e-05, %v1159_v42 }
 0x1e5   : > { %v1164_v45 = vadd.f32 1e-05, %v1160_v43  ;;  %2649 = vrsqrt.f32 %v1161_v63  ;;  %vm1171_vm1 = vweird.f32 %v1161_v63 }
 0x1e6   : > { %2651 = vrsqrt.f32 %v1162_v3  ;;  %vm1181_vm3 = vweird.f32 %v1162_v3  ;;  %vm1191_vm5 = vweird.f32 %v1163_v44 }
 0x1e7   : > { %2653 = vrsqrt.f32 %v1163_v44  ;;  %vm1201_vm8 = vweird.f32 %v1164_v45 }
 0x1e8   : > { %2655 = vrsqrt.f32 %v1164_v45 }
 0x1eb   : > { %v2650_v46 = vpop.eup %2649 }
 0x1ec   : > { %v2652_v4 = vpop.eup %2651  ;;  %v1166_v13 = vmul.f32 %v2650_v46, %v1161_v63  ;;  %vm1172_vm2 = vweird.f32 %v2650_v46 }
 0x1ed   : > { %v2654_v47 = vpop.eup %2653  ;;  %v1176_v57 = vmul.f32 %v2652_v4, %v1162_v3  ;;  %vm1182_vm4 = vweird.f32 %v2652_v4  ;;  %vm4126_vm7 = vmor %vm1171_vm1, %vm1172_vm2  ;;  %v1205_v3 = vld [vmem:[%s953_s7] sm:$0xff] }
 0x1ee   : > { %v2656_v58 = vpop.eup %2655  ;;  %v1167_v62 = vmul.f32 %v2650_v46, %v1166_v13  ;;  %v1186_v18 = vmul.f32 %v2654_v47, %v1163_v44  ;;  %vm1192_vm6 = vweird.f32 %v2654_v47  ;;  %vm1183_vm10 = vmor %vm1181_vm3, %vm1182_vm4 }
 0x1ef   : > { %v1177_v22 = vmul.f32 %v2652_v4, %v1176_v57  ;;  %v1196_v23 = vmul.f32 %v2656_v58, %v1164_v45  ;;  %vm1202_vm9 = vweird.f32 %v2656_v58  ;;  %vm1193_vm11 = vmor %vm1191_vm5, %vm1192_vm6  ;;  %v1263_v45 = vperm.slane %v1205_v3, 1 }
 0x1f0   : > { %v1168_v26 = vmul.f32 0.5, %v1167_v62  ;;  %v1187_v27 = vmul.f32 %v2654_v47, %v1186_v18  ;;  %vm1203_vm12 = vmor %vm1201_vm8, %vm1202_vm9  ;;  %v1266_v57 = vperm.slane %v1205_v3, 7 }
 0x1f1   : > { %v1178_v28 = vmul.f32 0.5, %v1177_v22  ;;  %v1197_v8 = vmul.f32 %v2656_v58, %v1196_v23 }
 0x1f2   : > { %v1169_v9 = vsub.f32 1.5, %v1168_v26  ;;  %v1188_v12 = vmul.f32 0.5, %v1187_v27  ;;  %v4135_v26 = vperm.slane %v1263_v45, 1 }
 0x1f3   : > { %v1179_v29 = vsub.f32 1.5, %v1178_v28  ;;  %v1198_v30 = vmul.f32 0.5, %v1197_v8  ;;  %v4141_v28 = vperm.slane %v1266_v57, 1 }
 0x1f4   : > { %v1170_v31 = vmul.f32 %v2650_v46, %v1169_v9  ;;  %v1189_v15 = vsub.f32 1.5, %v1188_v12 }
 0x1f5   : > { %v1180_v16 = vmul.f32 %v2652_v4, %v1179_v29  ;;  %v1199_v24 = vsub.f32 1.5, %v1198_v30  ;;  %v1303_v30 = vld [vmem:[%s4154_s9] sm:$0xff] }
 0x1f6   : > { %v1190_v19 = vmul.f32 %v2654_v47, %v1189_v15  ;;  %v1174_v20 = vsel %vm4126_vm7, %v2650_v46, %v1170_v31  ;;  %v1264_v46 = vperm.slane %v1205_v3, 3  ;;  %v1304_v15 = vld [vmem:[%s4154_s9 + $0x8] sm:$0xff] }
 0x1f7   : > { %v1184_v21 = vsel %vm1183_vm10, %v2652_v4, %v1180_v16  ;;  %v1200_v25 = vmul.f32 %v2656_v58, %v1199_v24  ;;  %v1265_v4 = vperm.slane %v1205_v3, 5  ;;  %v1305_v24 = vld [vmem:[%s4154_s9 + $0x10] sm:$0xff] }
 0x1f8   : > { %v1194_v39 = vsel %vm1193_vm11, %v2654_v47, %v1190_v19  ;;  %v1210_v40 = vrot.slane %v1184_v21, 6  ;;  %v1306_v19 = vld [vmem:[%s4154_s9 + $0x18] sm:$0xff]  ;;  %v1307_v21 = vld [vmem:[%s4154_s9 + $0x20] sm:$0xff] }
 0x1f9   : > { %v1204_v41 = vsel %vm1203_vm12, %v2656_v58, %v1200_v25  ;;  %v1211_v42 = vrot.slane %v1194_v39, 4  ;;  %v4137_v58 = vperm.slane %v1264_v46, 1  ;;  %v4139_v27 = vperm.slane %v1265_v4, 1 }
 0x1fa   : > { %v1212_v43 = vrot.slane %v1204_v41, 2  ;;  %v1214_v63 = vsel %vm1213_vm13, %v1174_v20, %v1210_v40 }
 0x1fc   : > { %v1216_v44 = vsel %vm1215_vm14, %v1211_v42, %v1212_v43  ;;  %v1308_v42 = vld [vmem:[%s4154_s9 + $0x28] sm:$0xff]  ;;  %v1310_v43 = vld [vmem:[%s4154_s9 + $0x38] sm:$0xff] }
 0x1fd   : > { %v1218_v13 = vsel %vm1217_vm15, %v1214_v63, %v1216_v44 }
 0x1fe   : > { %v1220_v62 = vmul.f32 %v1218_v13, %v1205_v3 }
 0x200   : > { %v1222_v18 = vperm.slane %v1220_v62, 0  ;;  %v1223_v22 = vperm.slane %v1220_v62, 2  ;;  %v1224_v23 = vperm.slane %v1220_v62, 4  ;;  %v1225_v47 = vperm.slane %v1220_v62, 6 }
 0x202   : > { %v4143_v8 = vperm.slane %v1222_v18, 0  ;;  %v4145_v9 = vperm.slane %v1223_v22, 0  ;;  %v4147_v12 = vperm.slane %v1224_v23, 0  ;;  %v4149_v17 = vperm.slane %v1225_v47, 0 }
 0x204   : > { %v1234_v29 = vmul.f32 %v4143_v8, %v3978_v32  ;;  %v1235_v31 = vmul.f32 %v4145_v9, %v3981_v33  ;;  %v1236_v16 = vmul.f32 %v4147_v12, %v3984_v34  ;;  %v1237_v32 = vmul.f32 %v4149_v17, %v3996_v38 }
 0x205   : > { %v1238_v20 = vmul.f32 %v4143_v8, %v3987_v35  ;;  %v1239_v25 = vmul.f32 %v4145_v9, %v3990_v36  ;;  %v1240_v33 = vmul.f32 %v4147_v12, %v3993_v37  ;;  %v1241_v39 = vmul.f32 %v4149_v17, %v3999_v48  ;;  %v1309_v35 = vld [vmem:[%s4154_s9 + $0x30] sm:$0xff] }
 0x206   : > { %v1275_v34 = vadd.f32 %v4135_v26, %v1234_v29  ;;  %v1276_v40 = vadd.f32 %v4137_v58, %v1235_v31  ;;  %v1277_v38 = vadd.f32 %v4139_v27, %v1236_v16  ;;  %v1278_v41 = vadd.f32 %v4141_v28, %v1237_v32  ;;  %v1311_v32 = vld [vmem:[%s4154_s9 + $0x40] sm:$0xff] }
 0x207   : > { %v1279_v63 = vadd.f32 %v4135_v26, %v1238_v20  ;;  %v1280_v36 = vadd.f32 %v4137_v58, %v1239_v25  ;;  %v1281_v37 = vadd.f32 %v4139_v27, %v1240_v33  ;;  %v1282_v3 = vadd.f32 %v4141_v28, %v1241_v39  ;;  %v1313_v25 = vld [vmem:[%s4154_s9 + $0x50] sm:$0xff]  ;;  %v1314_v33 = vld [vmem:[%s4154_s9 + $0x58] sm:$0xff]  ;;  %v1315_v39 = vld [vmem:[%s4154_s9 + $0x60] sm:$0xff] }
 0x208   : > { %v1331_v48 = vadd.f32 %v1303_v30, %v1275_v34  ;;  %v1332_v44 = vadd.f32 %v1304_v15, %v1276_v40  ;;  %v1333_v45 = vadd.f32 %v1305_v24, %v1277_v38  ;;  %v1334_v13 = vadd.f32 %v1306_v19, %v1278_v41  ;;  %v1312_v19 = vld [vmem:[%s4154_s9 + $0x48] sm:$0xff] }
 0x209   : > { %v1335_v46 = vadd.f32 %v1307_v21, %v1279_v63  ;;  %v1336_v4 = vadd.f32 %v1308_v42, %v1280_v36  ;;  %v1337_v57 = vadd.f32 %v1309_v35, %v1281_v37  ;;  %v1338_v62 = vadd.f32 %v1310_v43, %v1282_v3  ;;  %v1316_v41 = vld [vmem:[%s4154_s9 + $0x68] sm:$0xff]  ;;  %v1317_v42 = vld [vmem:[%s4154_s9 + $0x70] sm:$0xff] }
 0x20a   : > { %v1359_v18 = vmax.f32 %v1331_v48, 0.0  ;;  %v1360_v22 = vmax.f32 %v1332_v44, 0.0  ;;  %v1361_v23 = vmax.f32 %v1333_v45, 0.0  ;;  %v1362_v47 = vmax.f32 %v1334_v13, 0.0 }
 0x20b   : > { %v1363_v29 = vmax.f32 %v1335_v46, 0.0  ;;  %v1364_v31 = vmax.f32 %v1336_v4, 0.0  ;;  %v1365_v30 = vmax.f32 %v1337_v57, 0.0  ;;  %v1366_v16 = vmax.f32 %v1338_v62, 0.0 }
 0x20c   : > { %1387 = vst [vmem:[%s4187_s10] sm:$0xff] %v1359_v18  ;;  %v1242_v15 = vmul.f32 %v4143_v8, %v4002_v49  ;;  %v1243_v24 = vmul.f32 %v4145_v9, %v4005_v50  ;;  %v1244_v20 = vmul.f32 %v4147_v12, %v4008_v52  ;;  %v1245_v21 = vmul.f32 %v4149_v17, %v4011_v53 }
 0x20d   : > { %1388 = vst [vmem:[%s4187_s10 + $0x8] sm:$0xff] %v1360_v22  ;;  %v1246_v49 = vmul.f32 %v4143_v8, %v4014_v54  ;;  %v1247_v50 = vmul.f32 %v4145_v9, %v4017_v51  ;;  %v1248_v52 = vmul.f32 %v4147_v12, %v4020_v55  ;;  %v1249_v34 = vmul.f32 %v4149_v17, %v4023_v56  ;;  %v1318_v51 = vld [vmem:[%s4154_s9 + $0x78] sm:$0xff] }
 0x20e   : > { %1389 = vst [vmem:[%s4187_s10 + $0x10] sm:$0xff] %v1361_v23  ;;  %v1283_v53 = vadd.f32 %v4135_v26, %v1242_v15  ;;  %v1284_v40 = vadd.f32 %v4137_v58, %v1243_v24  ;;  %v1285_v38 = vadd.f32 %v4139_v27, %v1244_v20  ;;  %v1286_v54 = vadd.f32 %v4141_v28, %v1245_v21  ;;  %v1321_v24 = vld [vmem:[%s4154_s9 + $0x90] sm:$0xff] }
 0x20f   : > { %1390 = vst [vmem:[%s4187_s10 + $0x18] sm:$0xff] %v1362_v47  ;;  %v1287_v55 = vadd.f32 %v4135_v26, %v1246_v49  ;;  %v1288_v35 = vadd.f32 %v4137_v58, %v1247_v50  ;;  %v1289_v56 = vadd.f32 %v4139_v27, %v1248_v52  ;;  %v1290_v43 = vadd.f32 %v4141_v28, %v1249_v34  ;;  %v1325_v49 = vld [vmem:[%s4154_s9 + $0xb0] sm:$0xff] }
 0x210   : > { %1391 = vst [vmem:[%s4187_s10 + $0x20] sm:$0xff] %v1363_v29  ;;  %v1339_v63 = vadd.f32 %v1311_v32, %v1283_v53  ;;  %v1340_v36 = vadd.f32 %v1312_v19, %v1284_v40  ;;  %v1341_v37 = vadd.f32 %v1313_v25, %v1285_v38  ;;  %v1342_v3 = vadd.f32 %v1314_v33, %v1286_v54  ;;  %v1320_v32 = vld [vmem:[%s4154_s9 + $0x88] sm:$0xff]  ;;  %v1322_v19 = vld [vmem:[%s4154_s9 + $0x98] sm:$0xff]  ;;  %v1323_v33 = vld [vmem:[%s4154_s9 + $0xa0] sm:$0xff] }
 0x211   : > { %1392 = vst [vmem:[%s4187_s10 + $0x28] sm:$0xff] %v1364_v31  ;;  %v1343_v48 = vadd.f32 %v1315_v39, %v1287_v55  ;;  %v1344_v44 = vadd.f32 %v1316_v41, %v1288_v35  ;;  %v1345_v45 = vadd.f32 %v1317_v42, %v1289_v56  ;;  %v1346_v13 = vadd.f32 %v1318_v51, %v1290_v43  ;;  %v1319_v31 = vld [vmem:[%s4154_s9 + $0x80] sm:$0xff]  ;;  %v1326_v38 = vld [vmem:[%s4154_s9 + $0xb8] sm:$0xff] }
 0x212   : > { %1393 = vst [vmem:[%s4187_s10 + $0x30] sm:$0xff] %v1365_v30  ;;  %v1367_v46 = vmax.f32 %v1339_v63, 0.0  ;;  %v1368_v4 = vmax.f32 %v1340_v36, 0.0  ;;  %v1369_v57 = vmax.f32 %v1341_v37, 0.0  ;;  %v1370_v62 = vmax.f32 %v1342_v3, 0.0 }
 0x213   : > { %1394 = vst [vmem:[%s4187_s10 + $0x38] sm:$0xff] %v1366_v16  ;;  %v1371_v18 = vmax.f32 %v1343_v48, 0.0  ;;  %v1372_v22 = vmax.f32 %v1344_v44, 0.0  ;;  %v1373_v23 = vmax.f32 %v1345_v45, 0.0  ;;  %v1374_v47 = vmax.f32 %v1346_v13, 0.0 }
 0x214   : > { %1395 = vst [vmem:[%s4187_s10 + $0x40] sm:$0xff] %v1367_v46  ;;  %v1250_v29 = vmul.f32 %v4143_v8, %v4026_v59  ;;  %v1251_v30 = vmul.f32 %v4145_v9, %v4029_v60  ;;  %v1252_v15 = vmul.f32 %v4147_v12, %v4032_v61  ;;  %v1253_v16 = vmul.f32 %v4149_v17, %v4035_v0  ;;  %v1327_v36 = vld [vmem:[%s4154_s9 + $0xc0] sm:$0x1]  ;;  %v1328_v48 = vld [vmem:[%s4154_s9 + $0xc8] sm:$0x1] }
 0x215   : > { %1396 = vst [vmem:[%s4187_s10 + $0x48] sm:$0xff] %v1368_v4  ;;  %v1254_v59 = vmul.f32 %v4143_v8, %v4038_v1  ;;  %v1255_v60 = vmul.f32 %v4145_v9, %v4041_v2  ;;  %v1256_v61 = vmul.f32 %v4147_v12, %v4044_v5  ;;  %v1257_v20 = vmul.f32 %v4149_v17, %v4047_v6  ;;  %v1324_v2 = vld [vmem:[%s4154_s9 + $0xa8] sm:$0xff]  ;;  %v1329_v45 = vld [vmem:[%s4154_s9 + $0xd0] sm:$0x1] }
 0x216   : > { %1397 = vst [vmem:[%s4187_s10 + $0x50] sm:$0xff] %v1369_v57  ;;  %v1291_v0 = vadd.f32 %v4135_v26, %v1250_v29  ;;  %v1292_v21 = vadd.f32 %v4137_v58, %v1251_v30  ;;  %v1293_v25 = vadd.f32 %v4139_v27, %v1252_v15  ;;  %v1294_v1 = vadd.f32 %v4141_v28, %v1253_v16  ;;  %v1330_v57 = vld [vmem:[%s4154_s9 + $0xd8] sm:$0x1] }
 0x217   : > { %1398 = vst [vmem:[%s4187_s10 + $0x58] sm:$0xff] %v1370_v62  ;;  %v1295_v5 = vadd.f32 %v4135_v26, %v1254_v59  ;;  %v1296_v6 = vadd.f32 %v4137_v58, %v1255_v60  ;;  %v1297_v39 = vadd.f32 %v4139_v27, %v1256_v61  ;;  %v1298_v50 = vadd.f32 %v4141_v28, %v1257_v20 }
 0x218   : > { %1399 = vst [vmem:[%s4187_s10 + $0x60] sm:$0xff] %v1371_v18  ;;  %v1347_v52 = vadd.f32 %v1319_v31, %v1291_v0  ;;  %v1348_v34 = vadd.f32 %v1320_v32, %v1292_v21  ;;  %v1349_v53 = vadd.f32 %v1321_v24, %v1293_v25  ;;  %v1350_v40 = vadd.f32 %v1322_v19, %v1294_v1 }
 0x219   : > { %1400 = vst [vmem:[%s4187_s10 + $0x68] sm:$0xff] %v1372_v22  ;;  %v1351_v54 = vadd.f32 %v1323_v33, %v1295_v5  ;;  %v1352_v41 = vadd.f32 %v1324_v2, %v1296_v6  ;;  %v1353_v42 = vadd.f32 %v1325_v49, %v1297_v39  ;;  %v1354_v63 = vadd.f32 %v1326_v38, %v1298_v50 }
 0x21a   : > { %1401 = vst [vmem:[%s4187_s10 + $0x70] sm:$0xff] %v1373_v23  ;;  %v1375_v51 = vmax.f32 %v1347_v52, 0.0  ;;  %v1376_v55 = vmax.f32 %v1348_v34, 0.0  ;;  %v1377_v35 = vmax.f32 %v1349_v53, 0.0  ;;  %v1378_v56 = vmax.f32 %v1350_v40, 0.0 }
 0x21b   : > { %1402 = vst [vmem:[%s4187_s10 + $0x78] sm:$0xff] %v1374_v47  ;;  %v1379_v43 = vmax.f32 %v1351_v54, 0.0  ;;  %v1258_v37 = vmul.f32 %v4143_v8, %v4050_v7  ;;  %v1259_v3 = vmul.f32 %v4145_v9, %v4053_v10  ;;  %v1260_v44 = vmul.f32 %v4147_v12, %v4056_v11 }
 0x21c   : > { %1403 = vst [vmem:[%s4187_s10 + $0x80] sm:$0xff] %v1375_v51  ;;  %v1261_v13 = vmul.f32 %v4149_v17, %v4059_v14  ;;  %v1380_v46 = vmax.f32 %v1352_v41, 0.0  ;;  %v1381_v4 = vmax.f32 %v1353_v42, 0.0  ;;  %v1382_v14 = vmax.f32 %v1354_v63, 0.0 }
 0x21d   : > { %1404 = vst [vmem:[%s4187_s10 + $0x88] sm:$0xff] %v1376_v55  ;;  %v1299_v7 = vadd.f32 %v4135_v26, %v1258_v37  ;;  %v1300_v10 = vadd.f32 %v4137_v58, %v1259_v3  ;;  %v1301_v8 = vadd.f32 %v4139_v27, %v1260_v44 }
 0x21e   : > { %1405 = vst [vmem:[%s4187_s10 + $0x90] sm:$0xff] %v1377_v35  ;;  %v1302_v11 = vadd.f32 %v4141_v28, %v1261_v13 }
 0x21f   : > { %1406 = vst [vmem:[%s4187_s10 + $0x98] sm:$0xff] %v1378_v56  ;;  %v1355_v9 = vadd.f32 %v1327_v36, %v1299_v7  ;;  %v1356_v12 = vadd.f32 %v1328_v48, %v1300_v10  ;;  %v1357_v17 = vadd.f32 %v1329_v45, %v1301_v8 }
 0x220   : > { %1407 = vst [vmem:[%s4187_s10 + $0xa0] sm:$0xff] %v1379_v43  ;;  %v1358_v62 = vadd.f32 %v1330_v57, %v1302_v11 }
 0x221   : > { %1408 = vst [vmem:[%s4187_s10 + $0xa8] sm:$0xff] %v1380_v46  ;;  %v1383_v26 = vmax.f32 %v1355_v9, 0.0  ;;  %v1384_v18 = vmax.f32 %v1356_v12, 0.0  ;;  %v1385_v58 = vmax.f32 %v1357_v17, 0.0 }
 0x222   : > { %1409 = vst [vmem:[%s4187_s10 + $0xb0] sm:$0xff] %v1381_v4  ;;  %v1386_v27 = vmax.f32 %v1358_v62, 0.0 }
 0x223   : > { %1410 = vst [vmem:[%s4187_s10 + $0xb8] sm:$0xff] %v1382_v14  ;;  %1421 = sbr.rel (!%p3138_p5) target bundleno = 768 (0x300), region = 168 }
 0x224   : > { %1411 = vst [vmem:[%s4187_s10 + $0xc0] sm:$0x1] %v1383_v26 }
 0x225   : > { %1412 = vst [vmem:[%s4187_s10 + $0xc8] sm:$0x1] %v1384_v18 }
 0x226   : > { %1413 = vst [vmem:[%s4187_s10 + $0xd0] sm:$0x1] %v1385_v58 }
 0x227   : > { %1414 = vst [vmem:[%s4187_s10 + $0xd8] sm:$0x1] %v1386_v27 }
 0x228   : > { %s4769_s5 = smov (!%p1424_p9, %s1423_s5), 4 }
 0x229   : > { %s1426_s11 = smul.u32 56, %s4769_s5  ;;  %s4306_s17 = sshll.u32 %s4769_s5, 3 }
 0x22b   : > { %p2180_p10 = scmp.eq.s32.totalorder %s1426_s11, 0 }
 0x22c   : > { %p1434_p11 = scmp.lt.u32.totalorder (!%p2180_p10), %s4306_s17, 8 }
 0x22d   : > { %1433 = sbr.rel (%p2180_p10) target bundleno = 768 (0x300), region = 172 }
 0x232   : > { %1437 = sbr.rel (%p1434_p11) target bundleno = 753 (0x2f1), region = 176  ;;  %s4310_s21 = sand.u32 (!%p1434_p11), 7, %s4306_s17  }
 0x233   : > { %p1466_p5 = scmp.eq.s32.totalorder (!%p1434_p11), %s4310_s21, 0  ;;  %p2181_p12 = scmp.ne.s32.totalorder (!%p1434_p11), %s4310_s21, 0 }
 0x237   : > { %1469 = sbr.rel (%p2181_p12) target bundleno = 654 (0x28e), region = 191  ;;  %s1470_s15 = sshrl.u32 (!%p2181_p12), %s4306_s17, 3 }
 0x238   : > { %2657 = sdivrem.u32 (!%p2181_p12), %s1470_s15, 6 }
 0x241   : > { %s4317_s6 = spop.drf %2657 }
 0x242   : > { %s2659_s30 = spop.drf %2657  ;;  %p2182_p13 = scmp.le.s32.totalorder %s4317_s6, 0 }
 0x243   : > { %s4727_s23 = smov (!%p2182_p13), %s4304_s22  ;;  %s4728_s27 = smov (!%p2182_p13), %s4187_s10 }
 0x244   : > { %2044 = sbr.rel (%p2182_p13) target bundleno = 628 (0x274), region = 412  ;;  %s4326_s24 = smov (!%p2182_p13), 0  }
 0x245   : > { %s4328_s25 = smov (!%p2182_p13), 0  }
 0x249 LB: >> { %v1482_v28 = vld [vmem:[%s3019_s27] sm:$0xff]  ;;  %v1484_v22 = vld [vmem:[%s3019_s27 + $0x8] sm:$0xff]  ;;  %v1486_v23 = vld [vmem:[%s3019_s27 + $0x10] sm:$0xff]  ;;  %s1566_s26 = sadd.s32 1, %s3023_s24  ;;  %s1476_s25 = sadd.s32 1, %s3027_s25   ;;  %s3027_s25 = sphi %s4328_s25, %s1476_s25   ;;  %s3023_s24 = sphi %s4326_s24, %s4731_s24   ;;  %s3019_s27 = sphi %s4728_s27, %s4730_s27   ;;  %s3015_s23 = sphi %s4727_s23, %s4729_s23  }
 0x24a   : >> { %1483 = vst [vmem:[%s3015_s23] sm:$0xff] %v1482_v28  ;;  %v1488_v47 = vld [vmem:[%s3019_s27 + $0x18] sm:$0xff]  ;;  %p1567_p4 = scmp.ge.s32.totalorder %s1566_s26, %s4317_s6  ;;  %v1490_v29 = vld [vmem:[%s3019_s27 + $0x20] sm:$0xff]  ;;  %v1492_v31 = vld [vmem:[%s3019_s27 + $0x28] sm:$0xff]  ;;  %p1475_p0 = scmp.ge.s32.totalorder %s1476_s25, %s4317_s6 }
 0x24b   : >> { %1485 = vst [vmem:[%s3015_s23 + $0x8] sm:$0xff] %v1484_v22  ;;  %v1498_v30 = vld [vmem:[%s3019_s27 + $0x30] sm:$0xff]  ;;  %v1500_v15 = vld [vmem:[%s3019_s27 + $0x38] sm:$0xff]  ;;  %v1502_v16 = vld [vmem:[%s3019_s27 + $0x40] sm:$0xff] }
 0x24c   : >> { %1487 = vst [vmem:[%s3015_s23 + $0x10] sm:$0xff] %v1486_v23  ;;  %s4771_s26 = smov (%p1567_p4, %s1566_s26), 0  ;;  %v1504_v32 = vld [vmem:[%s3019_s27 + $0x48] sm:$0xff]  ;;  %v1510_v24 = vld [vmem:[%s3019_s27 + $0x50] sm:$0xff]  ;;  %v1512_v19 = vld [vmem:[%s3019_s27 + $0x58] sm:$0xff] }
 0x24d   : >> { %1489 = vst [vmem:[%s3015_s23 + $0x18] sm:$0xff] %v1488_v47  ;;  %s1569_s12 = smul.u32 48, %s4771_s26  ;;  %v1514_v59 = vld [vmem:[%s3019_s27 + $0x60] sm:$0xff]  ;;  %v1516_v60 = vld [vmem:[%s3019_s27 + $0x68] sm:$0xff]  ;;  %v1522_v61 = vld [vmem:[%s3019_s27 + $0x70] sm:$0xff]  ;;  %s4731_s24 = smov %s4771_s26 }
 0x24e   : >> { %1491 = vst [vmem:[%s3015_s23 + $0x20] sm:$0xff] %v1490_v29  ;;  %v1524_v20 = vld [vmem:[%s3019_s27 + $0x78] sm:$0xff]  ;;  %v1526_v0 = vld [vmem:[%s3019_s27 + $0x80] sm:$0xff]  ;;  %v1528_v21 = vld [vmem:[%s3019_s27 + $0x88] sm:$0xff] }
 0x24f   : >> { %1493 = vst [vmem:[%s3015_s23 + $0x28] sm:$0xff] %v1492_v31  ;;  %s4360_s14 = scalar_lea.vmem %s4187_s10, %s1569_s12 [#allocation4]   ;;  %s4363_s29 = scalar_lea.vmem %s4304_s22, %s1569_s12   ;;  %v1534_v25 = vld [vmem:[%s3019_s27 + $0x90] sm:$0xff]  ;;  %v1536_v1 = vld [vmem:[%s3019_s27 + $0x98] sm:$0xff]  ;;  %v1538_v33 = vld [vmem:[%s3019_s27 + $0xa0] sm:$0xff] }
 0x250   : >> { %1495 = vst [vmem:[%s3015_s23 + $0x38] sm:$0xff] %v1490_v29  ;;  %v1540_v2 = vld [vmem:[%s3019_s27 + $0xa8] sm:$0xff]  ;;  %v1546_v49 = vld [vmem:[%s3019_s27 + $0xb0] sm:$0xff]  ;;  %v1548_v5 = vld [vmem:[%s3019_s27 + $0xb8] sm:$0xff] }
 0x251   : >> { %1497 = vst [vmem:[%s3015_s23 + $0x40] sm:$0xff] %v1492_v31  ;;  %v1550_v6 = vld [vmem:[%s3019_s27 + $0xc0] sm:$0xff]  ;;  %v1552_v39 = vld [vmem:[%s3019_s27 + $0xc8] sm:$0xff]  ;;  %v1558_v50 = vld [vmem:[%s3019_s27 + $0xd0] sm:$0xff] }
 0x252   : >> { %1499 = vst [vmem:[%s3015_s23 + $0x48] sm:$0xff] %v1498_v30  ;;  %v1560_v52 = vld [vmem:[%s3019_s27 + $0xd8] sm:$0xff]  ;;  %v1562_v34 = vld [vmem:[%s3019_s27 + $0xe0] sm:$0xff]  ;;  %v1564_v53 = vld [vmem:[%s3019_s27 + $0xe8] sm:$0xff]  ;;  %s4730_s27 = smov %s4360_s14 }
 0x253   : >> { %1501 = vst [vmem:[%s3015_s23 + $0x50] sm:$0xff] %v1500_v15 }
 0x254   : >> { %1503 = vst [vmem:[%s3015_s23 + $0x58] sm:$0xff] %v1502_v16 }
 0x255   : >> { %1505 = vst [vmem:[%s3015_s23 + $0x60] sm:$0xff] %v1504_v32 }
 0x256   : >> { %1507 = vst [vmem:[%s3015_s23 + $0x70] sm:$0xff] %v1502_v16 }
 0x257   : >> { %1509 = vst [vmem:[%s3015_s23 + $0x78] sm:$0xff] %v1504_v32 }
 0x258   : >> { %1511 = vst [vmem:[%s3015_s23 + $0x80] sm:$0xff] %v1510_v24 }
 0x259   : >> { %1513 = vst [vmem:[%s3015_s23 + $0x88] sm:$0xff] %v1512_v19 }
 0x25a   : >> { %1515 = vst [vmem:[%s3015_s23 + $0x90] sm:$0xff] %v1514_v59 }
 0x25b   : >> { %1517 = vst [vmem:[%s3015_s23 + $0x98] sm:$0xff] %v1516_v60 }
 0x25c   : >> { %1519 = vst [vmem:[%s3015_s23 + $0xa8] sm:$0xff] %v1514_v59 }
 0x25d   : >> { %1521 = vst [vmem:[%s3015_s23 + $0xb0] sm:$0xff] %v1516_v60 }
 0x25e   : >> { %1523 = vst [vmem:[%s3015_s23 + $0xb8] sm:$0xff] %v1522_v61 }
 0x25f   : >> { %1525 = vst [vmem:[%s3015_s23 + $0xc0] sm:$0xff] %v1524_v20 }
 0x260   : >> { %1527 = vst [vmem:[%s3015_s23 + $0xc8] sm:$0xff] %v1526_v0 }
 0x261   : >> { %1529 = vst [vmem:[%s3015_s23 + $0xd0] sm:$0xff] %v1528_v21 }
 0x262   : >> { %1531 = vst [vmem:[%s3015_s23 + $0xe0] sm:$0xff] %v1526_v0 }
 0x263   : >> { %1533 = vst [vmem:[%s3015_s23 + $0xe8] sm:$0xff] %v1528_v21 }
 0x264   : >> { %1535 = vst [vmem:[%s3015_s23 + $0xf0] sm:$0xff] %v1534_v25 }
 0x265   : >> { %1537 = vst [vmem:[%s3015_s23 + $0xf8] sm:$0xff] %v1536_v1 }
 0x266   : >> { %1539 = vst [vmem:[%s3015_s23 + $0x100] sm:$0xff] %v1538_v33 }
 0x267   : >> { %1541 = vst [vmem:[%s3015_s23 + $0x108] sm:$0xff] %v1540_v2 }
 0x268   : >> { %1543 = vst [vmem:[%s3015_s23 + $0x118] sm:$0xff] %v1538_v33 }
 0x269   : >> { %1545 = vst [vmem:[%s3015_s23 + $0x120] sm:$0xff] %v1540_v2 }
 0x26a   : >> { %1547 = vst [vmem:[%s3015_s23 + $0x128] sm:$0xff] %v1546_v49 }
 0x26b   : >> { %1549 = vst [vmem:[%s3015_s23 + $0x130] sm:$0xff] %v1548_v5 }
 0x26c   : >> { %1551 = vst [vmem:[%s3015_s23 + $0x138] sm:$0xff] %v1550_v6 }
 0x26d   : >> { %1553 = vst [vmem:[%s3015_s23 + $0x140] sm:$0xff] %v1552_v39 }
 0x26e   : >> { %1555 = vst [vmem:[%s3015_s23 + $0x150] sm:$0xff] %v1550_v6 }
 0x26f   : >> { %1557 = vst [vmem:[%s3015_s23 + $0x158] sm:$0xff] %v1552_v39  ;;  %1478 = sbr.rel (!%p1475_p0) target bundleno = 585 (0x249), region = 418 }
 0x270   : >> { %1559 = vst [vmem:[%s3015_s23 + $0x160] sm:$0xff] %v1558_v50 }
 0x271   : >> { %1561 = vst [vmem:[%s3015_s23 + $0x168] sm:$0xff] %v1560_v52 }
 0x272   : >> { %1563 = vst [vmem:[%s3015_s23 + $0x170] sm:$0xff] %v1562_v34 }
 0x273   : >> { %1565 = vst [vmem:[%s3015_s23 + $0x178] sm:$0xff] %v1564_v53  ;;  %s4729_s23 = smov %s4363_s29 }
 0x274 PF: > { %2660 = sdivrem.u32 %s1470_s15, 6 }
 0x275   : > { %s2183_s20 = smul.u32 48, %s4317_s6 }
 0x277   : > { %s4439_s28 = scalar_lea.vmem %s4187_s10, %s2183_s20 [#allocation4]   ;;  %s4442_s7 = scalar_lea.vmem %s4304_s22, %s2183_s20  }
 0x27d   : > { %s2661_s9 = spop.drf %2660 }
 0x27e   : > { %s4444_s5 = spop.drf %2660 }
 0x27f   : > { %p2185_p1 = scmp.le.s32.totalorder %s4444_s5, 0 }
 0x280   : > { %s4732_s4 = smov (!%p2185_p1), %s4442_s7  ;;  %s4733_s18 = smov (!%p2185_p1), %s4439_s28 }
 0x281   : > { %2058 = sbr.rel (%p2185_p1) target bundleno = 654 (0x28e), region = 423  ;;  %s4453_s8 = smov (!%p2185_p1), 0  }
 0x282   : > { %s4455_s11 = smov (!%p2185_p1), 0  }
 0x286 LB: >> { %v1589_v40 = vld [vmem:[%s3035_s18] sm:$0xff]  ;;  %s1603_s15 = sadd.s32 1, %s3039_s8  ;;  %s1583_s11 = sadd.s32 1, %s3043_s11   ;;  %s3043_s11 = sphi %s4455_s11, %s1583_s11   ;;  %s3039_s8 = sphi %s4453_s8, %s4735_s8   ;;  %s3035_s18 = sphi %s4733_s18, %s1608_s18   ;;  %s3031_s4 = sphi %s4732_s4, %s4734_s4  }
 0x287   : >> { %v1591_v38 = vld [vmem:[%s3035_s18 + $0x20] sm:$0xff]  ;;  %1590 = vst [vmem:[%s3031_s4] sm:$0xff] %v1589_v40  ;;  %p1604_p2 = scmp.ge.s32.totalorder %s1603_s15, %s4444_s5  ;;  %p1582_p3 = scmp.ge.s32.totalorder %s1583_s11, %s4444_s5 }
 0x288   : >> { %v1593_v54 = vld [vmem:[%s3035_s18 + $0x40] sm:$0xff]  ;;  %1592 = vst [vmem:[%s3031_s4 + $0x38] sm:$0xff] %v1591_v38 }
 0x289   : >> { %v1595_v41 = vld [vmem:[%s3035_s18 + $0x60] sm:$0xff]  ;;  %1594 = vst [vmem:[%s3031_s4 + $0x70] sm:$0xff] %v1593_v54  ;;  %s4773_s15 = smov (%p1604_p2, %s1603_s15), 0  ;;  %1585 = sbr.rel (!%p1582_p3) target bundleno = 646 (0x286), region = 429 }
 0x28a   : >> { %v1597_v42 = vld [vmem:[%s3035_s18 + $0x80] sm:$0xff]  ;;  %1596 = vst [vmem:[%s3031_s4 + $0xa8] sm:$0xff] %v1595_v41  ;;  %s2186_s6 = sshll.u32 %s4773_s15, 3  ;;  %s4735_s8 = smov %s4773_s15 }
 0x28b   : >> { %v1599_v51 = vld [vmem:[%s3035_s18 + $0xa0] sm:$0xff]  ;;  %1598 = vst [vmem:[%s3031_s4 + $0xe0] sm:$0xff] %v1597_v42  ;;  %s1609_s30 = scalar_lea.vmem %s4442_s7, %s2186_s6  }
 0x28c   : >> { %v1601_v55 = vld [vmem:[%s3035_s18 + $0xc0] sm:$0xff]  ;;  %1600 = vst [vmem:[%s3031_s4 + $0x118] sm:$0xff] %v1599_v51  ;;  %s1608_s18 = scalar_lea.vmem %s4439_s28, %s2186_s6 [#allocation4]  }
 0x28d   : >> { %1602 = vst [vmem:[%s3031_s4 + $0x150] sm:$0xff] %v1601_v55  ;;  %s4734_s4 = smov %s1609_s30 }
 0x28e PF: > { %1612 = sbr.rel (%p1466_p5) target bundleno = 753 (0x2f1), region = 209  ;;  %s1614_s23 = ssub.s32 (!%p1466_p5), %s4306_s17, %s4310_s21 }
 0x28f   : > { %s1618_s27 = sshrl.u32 (!%p1466_p5), %s4306_s17, 3  ;;  %s4479_s24 = scalar_lea.vmem (!%p1466_p5), %s4187_s10, %s1614_s23 [#allocation4] }
 0x290   : > { %s4482_s25 = scalar_lea.vmem (!%p1466_p5), %s4304_s22, %s1614_s23  ;;  %2663 = sdivrem.u32 (!%p1466_p5), %s1618_s27, 6 }
 0x299   : > { %s4486_s26 = spop.drf %2663 }
 0x29a   : > { %s2665_s12 = spop.drf %2663  ;;  %p2188_p6 = scmp.le.s32.totalorder %s4486_s26, 0 }
 0x29b   : > { %s4736_s14 = smov (!%p2188_p6), %s4304_s22  ;;  %s4737_s29 = smov (!%p2188_p6), %s4187_s10 }
 0x29c   : > { %2072 = sbr.rel (%p2188_p6) target bundleno = 716 (0x2cc), region = 434  ;;  %s4495_s20 = smov (!%p2188_p6), 0  }
 0x29d   : > { %s4497_s28 = smov (!%p2188_p6), 0  }
 0x2a1 LB: >> { %v1630_v35 = vld [vmem:[%s3051_s29] sm:$0xff]  ;;  %v1632_v56 = vld [vmem:[%s3051_s29 + $0x8] sm:$0xff]  ;;  %v1634_v43 = vld [vmem:[%s3051_s29 + $0x10] sm:$0xff]  ;;  %s1714_s7 = sadd.s32 1, %s3055_s20  ;;  %s1624_s28 = sadd.s32 1, %s3059_s28   ;;  %s3059_s28 = sphi %s4497_s28, %s1624_s28   ;;  %s3055_s20 = sphi %s4495_s20, %s4740_s20   ;;  %s3051_s29 = sphi %s4737_s29, %s4739_s29   ;;  %s3047_s14 = sphi %s4736_s14, %s4738_s14  }
 0x2a2   : >> { %1631 = vst [vmem:[%s3047_s14] sm:$0xff] %v1630_v35  ;;  %v1636_v63 = vld [vmem:[%s3051_s29 + $0x18] sm:$0xff]  ;;  %p1715_p7 = scmp.ge.s32.totalorder %s1714_s7, %s4486_s26  ;;  %v1638_v36 = vld [vmem:[%s3051_s29 + $0x20] sm:$0xff]  ;;  %v1640_v37 = vld [vmem:[%s3051_s29 + $0x28] sm:$0xff]  ;;  %p1623_p8 = scmp.ge.s32.totalorder %s1624_s28, %s4486_s26 }
 0x2a3   : >> { %1633 = vst [vmem:[%s3047_s14 + $0x8] sm:$0xff] %v1632_v56  ;;  %v1646_v3 = vld [vmem:[%s3051_s29 + $0x30] sm:$0xff]  ;;  %v1648_v48 = vld [vmem:[%s3051_s29 + $0x38] sm:$0xff]  ;;  %v1650_v44 = vld [vmem:[%s3051_s29 + $0x40] sm:$0xff] }
 0x2a4   : >> { %1635 = vst [vmem:[%s3047_s14 + $0x10] sm:$0xff] %v1634_v43  ;;  %s4775_s7 = smov (%p1715_p7, %s1714_s7), 0  ;;  %v1652_v45 = vld [vmem:[%s3051_s29 + $0x48] sm:$0xff]  ;;  %v1658_v13 = vld [vmem:[%s3051_s29 + $0x50] sm:$0xff]  ;;  %v1660_v46 = vld [vmem:[%s3051_s29 + $0x58] sm:$0xff] }
 0x2a5   : >> { %1637 = vst [vmem:[%s3047_s14 + $0x18] sm:$0xff] %v1636_v63  ;;  %s1717_s9 = smul.u32 48, %s4775_s7  ;;  %v1662_v4 = vld [vmem:[%s3051_s29 + $0x60] sm:$0xff]  ;;  %v1664_v57 = vld [vmem:[%s3051_s29 + $0x68] sm:$0xff]  ;;  %v1670_v7 = vld [vmem:[%s3051_s29 + $0x70] sm:$0xff]  ;;  %s4740_s20 = smov %s4775_s7 }
 0x2a6   : >> { %1639 = vst [vmem:[%s3047_s14 + $0x20] sm:$0xff] %v1638_v36  ;;  %v1672_v10 = vld [vmem:[%s3051_s29 + $0x78] sm:$0xff]  ;;  %v1674_v8 = vld [vmem:[%s3051_s29 + $0x80] sm:$0xff]  ;;  %v1676_v11 = vld [vmem:[%s3051_s29 + $0x88] sm:$0xff] }
 0x2a7   : >> { %1641 = vst [vmem:[%s3047_s14 + $0x28] sm:$0xff] %v1640_v37  ;;  %s4529_s5 = scalar_lea.vmem %s4187_s10, %s1717_s9 [#allocation4]   ;;  %s4532_s4 = scalar_lea.vmem %s4304_s22, %s1717_s9   ;;  %v1682_v14 = vld [vmem:[%s3051_s29 + $0x90] sm:$0xff]  ;;  %v1684_v9 = vld [vmem:[%s3051_s29 + $0x98] sm:$0xff]  ;;  %v1686_v12 = vld [vmem:[%s3051_s29 + $0xa0] sm:$0xff] }
 0x2a8   : >> { %1643 = vst [vmem:[%s3047_s14 + $0x38] sm:$0xff] %v1638_v36  ;;  %v1688_v17 = vld [vmem:[%s3051_s29 + $0xa8] sm:$0xff]  ;;  %v1694_v62 = vld [vmem:[%s3051_s29 + $0xb0] sm:$0xff]  ;;  %v1696_v26 = vld [vmem:[%s3051_s29 + $0xb8] sm:$0xff] }
 0x2a9   : >> { %1645 = vst [vmem:[%s3047_s14 + $0x40] sm:$0xff] %v1640_v37  ;;  %v1698_v18 = vld [vmem:[%s3051_s29 + $0xc0] sm:$0xff]  ;;  %v1700_v58 = vld [vmem:[%s3051_s29 + $0xc8] sm:$0xff]  ;;  %v1706_v27 = vld [vmem:[%s3051_s29 + $0xd0] sm:$0xff] }
 0x2aa   : >> { %1647 = vst [vmem:[%s3047_s14 + $0x48] sm:$0xff] %v1646_v3  ;;  %v1708_v28 = vld [vmem:[%s3051_s29 + $0xd8] sm:$0xff]  ;;  %v1710_v22 = vld [vmem:[%s3051_s29 + $0xe0] sm:$0xff]  ;;  %v1712_v23 = vld [vmem:[%s3051_s29 + $0xe8] sm:$0xff]  ;;  %s4739_s29 = smov %s4529_s5 }
 0x2ab   : >> { %1649 = vst [vmem:[%s3047_s14 + $0x50] sm:$0xff] %v1648_v48 }
 0x2ac   : >> { %1651 = vst [vmem:[%s3047_s14 + $0x58] sm:$0xff] %v1650_v44 }
 0x2ad   : >> { %1653 = vst [vmem:[%s3047_s14 + $0x60] sm:$0xff] %v1652_v45 }
 0x2ae   : >> { %1655 = vst [vmem:[%s3047_s14 + $0x70] sm:$0xff] %v1650_v44 }
 0x2af   : >> { %1657 = vst [vmem:[%s3047_s14 + $0x78] sm:$0xff] %v1652_v45 }
 0x2b0   : >> { %1659 = vst [vmem:[%s3047_s14 + $0x80] sm:$0xff] %v1658_v13 }
 0x2b1   : >> { %1661 = vst [vmem:[%s3047_s14 + $0x88] sm:$0xff] %v1660_v46 }
 0x2b2   : >> { %1663 = vst [vmem:[%s3047_s14 + $0x90] sm:$0xff] %v1662_v4 }
 0x2b3   : >> { %1665 = vst [vmem:[%s3047_s14 + $0x98] sm:$0xff] %v1664_v57 }
 0x2b4   : >> { %1667 = vst [vmem:[%s3047_s14 + $0xa8] sm:$0xff] %v1662_v4 }
 0x2b5   : >> { %1669 = vst [vmem:[%s3047_s14 + $0xb0] sm:$0xff] %v1664_v57 }
 0x2b6   : >> { %1671 = vst [vmem:[%s3047_s14 + $0xb8] sm:$0xff] %v1670_v7 }
 0x2b7   : >> { %1673 = vst [vmem:[%s3047_s14 + $0xc0] sm:$0xff] %v1672_v10 }
 0x2b8   : >> { %1675 = vst [vmem:[%s3047_s14 + $0xc8] sm:$0xff] %v1674_v8 }
 0x2b9   : >> { %1677 = vst [vmem:[%s3047_s14 + $0xd0] sm:$0xff] %v1676_v11 }
 0x2ba   : >> { %1679 = vst [vmem:[%s3047_s14 + $0xe0] sm:$0xff] %v1674_v8 }
 0x2bb   : >> { %1681 = vst [vmem:[%s3047_s14 + $0xe8] sm:$0xff] %v1676_v11 }
 0x2bc   : >> { %1683 = vst [vmem:[%s3047_s14 + $0xf0] sm:$0xff] %v1682_v14 }
 0x2bd   : >> { %1685 = vst [vmem:[%s3047_s14 + $0xf8] sm:$0xff] %v1684_v9 }
 0x2be   : >> { %1687 = vst [vmem:[%s3047_s14 + $0x100] sm:$0xff] %v1686_v12 }
 0x2bf   : >> { %1689 = vst [vmem:[%s3047_s14 + $0x108] sm:$0xff] %v1688_v17 }
 0x2c0   : >> { %1691 = vst [vmem:[%s3047_s14 + $0x118] sm:$0xff] %v1686_v12 }
 0x2c1   : >> { %1693 = vst [vmem:[%s3047_s14 + $0x120] sm:$0xff] %v1688_v17 }
 0x2c2   : >> { %1695 = vst [vmem:[%s3047_s14 + $0x128] sm:$0xff] %v1694_v62 }
 0x2c3   : >> { %1697 = vst [vmem:[%s3047_s14 + $0x130] sm:$0xff] %v1696_v26 }
 0x2c4   : >> { %1699 = vst [vmem:[%s3047_s14 + $0x138] sm:$0xff] %v1698_v18 }
 0x2c5   : >> { %1701 = vst [vmem:[%s3047_s14 + $0x140] sm:$0xff] %v1700_v58 }
 0x2c6   : >> { %1703 = vst [vmem:[%s3047_s14 + $0x150] sm:$0xff] %v1698_v18 }
 0x2c7   : >> { %1705 = vst [vmem:[%s3047_s14 + $0x158] sm:$0xff] %v1700_v58  ;;  %1626 = sbr.rel (!%p1623_p8) target bundleno = 673 (0x2a1), region = 440 }
 0x2c8   : >> { %1707 = vst [vmem:[%s3047_s14 + $0x160] sm:$0xff] %v1706_v27 }
 0x2c9   : >> { %1709 = vst [vmem:[%s3047_s14 + $0x168] sm:$0xff] %v1708_v28 }
 0x2ca   : >> { %1711 = vst [vmem:[%s3047_s14 + $0x170] sm:$0xff] %v1710_v22 }
 0x2cb   : >> { %1713 = vst [vmem:[%s3047_s14 + $0x178] sm:$0xff] %v1712_v23  ;;  %s4738_s14 = smov %s4532_s4 }
 0x2cc PF: > { %2666 = sdivrem.u32 %s1618_s27, 6 }
 0x2cd   : > { %s2189_s18 = smul.u32 48, %s4486_s26 }
 0x2cf   : > { %s4608_s8 = scalar_lea.vmem %s4187_s10, %s2189_s18 [#allocation4]   ;;  %s4611_s11 = scalar_lea.vmem %s4304_s22, %s2189_s18  }
 0x2d5   : > { %s2667_s15 = spop.drf %2666 }
 0x2d6   : > { %s4613_s6 = spop.drf %2666 }
 0x2d7   : > { %p2191_p9 = scmp.le.s32.totalorder %s4613_s6, 0 }
 0x2d8   : > { %s4741_s30 = smov (!%p2191_p9), %s4611_s11  ;;  %s4742_s23 = smov (!%p2191_p9), %s4608_s8 }
 0x2d9   : > { %2086 = sbr.rel (%p2191_p9) target bundleno = 742 (0x2e6), region = 445  ;;  %s4622_s12 = smov (!%p2191_p9), 0  }
 0x2da   : > { %s4624_s27 = smov (!%p2191_p9), 0  }
 0x2de LB: >> { %v1737_v47 = vld [vmem:[%s3067_s23] sm:$0xff]  ;;  %s1751_s26 = sadd.s32 1, %s3071_s12  ;;  %s1731_s27 = sadd.s32 1, %s3075_s27   ;;  %s3075_s27 = sphi %s4624_s27, %s1731_s27   ;;  %s3071_s12 = sphi %s4622_s12, %s4744_s12   ;;  %s3067_s23 = sphi %s4742_s23, %s1756_s23   ;;  %s3063_s30 = sphi %s4741_s30, %s4743_s30  }
 0x2df   : >> { %v1739_v29 = vld [vmem:[%s3067_s23 + $0x20] sm:$0xff]  ;;  %1738 = vst [vmem:[%s3063_s30] sm:$0xff] %v1737_v47  ;;  %p1752_p10 = scmp.ge.s32.totalorder %s1751_s26, %s4613_s6  ;;  %p1730_p11 = scmp.ge.s32.totalorder %s1731_s27, %s4613_s6 }
 0x2e0   : >> { %v1741_v31 = vld [vmem:[%s3067_s23 + $0x40] sm:$0xff]  ;;  %1740 = vst [vmem:[%s3063_s30 + $0x38] sm:$0xff] %v1739_v29 }
 0x2e1   : >> { %v1743_v30 = vld [vmem:[%s3067_s23 + $0x60] sm:$0xff]  ;;  %1742 = vst [vmem:[%s3063_s30 + $0x70] sm:$0xff] %v1741_v31  ;;  %s4777_s26 = smov (%p1752_p10, %s1751_s26), 0  ;;  %1733 = sbr.rel (!%p1730_p11) target bundleno = 734 (0x2de), region = 451 }
 0x2e2   : >> { %v1745_v15 = vld [vmem:[%s3067_s23 + $0x80] sm:$0xff]  ;;  %1744 = vst [vmem:[%s3063_s30 + $0xa8] sm:$0xff] %v1743_v30  ;;  %s2192_s14 = sshll.u32 %s4777_s26, 3  ;;  %s4744_s12 = smov %s4777_s26 }
 0x2e3   : >> { %v1747_v16 = vld [vmem:[%s3067_s23 + $0xa0] sm:$0xff]  ;;  %1746 = vst [vmem:[%s3063_s30 + $0xe0] sm:$0xff] %v1745_v15  ;;  %s1757_s29 = scalar_lea.vmem %s4611_s11, %s2192_s14  }
 0x2e4   : >> { %v1749_v32 = vld [vmem:[%s3067_s23 + $0xc0] sm:$0xff]  ;;  %1748 = vst [vmem:[%s3063_s30 + $0x118] sm:$0xff] %v1747_v16  ;;  %s1756_s23 = scalar_lea.vmem %s4608_s8, %s2192_s14 [#allocation4]  }
 0x2e5   : >> { %1750 = vst [vmem:[%s3063_s30 + $0x150] sm:$0xff] %v1749_v32  ;;  %s4743_s30 = smov %s1757_s29 }
 0x2e6 PF: > { %s3081_s20 = smov 1  }
 0x2e7   : > { %s1758_s28 = sshll.u32 %s3081_s20, %s4310_s21 }
 0x2e8   : > { %s2194_s7 = sadd.s32 4294967295, %s1758_s28 }
 0x2e9   : > { %v1768_v24 = vld [vmem:[%s4479_s24] sm:%s2194_s7] }
 0x2ea   : > { %v1770_v19 = vld [vmem:[%s4479_s24 + $0x20] sm:%s2194_s7]  ;;  %1769 = vst [vmem:[%s4482_s25] sm:%s2194_s7] %v1768_v24 }
 0x2eb   : > { %v1772_v59 = vld [vmem:[%s4479_s24 + $0x40] sm:%s2194_s7]  ;;  %1771 = vst [vmem:[%s4482_s25 + $0x38] sm:%s2194_s7] %v1770_v19 }
 0x2ec   : > { %v1774_v60 = vld [vmem:[%s4479_s24 + $0x60] sm:%s2194_s7]  ;;  %1773 = vst [vmem:[%s4482_s25 + $0x70] sm:%s2194_s7] %v1772_v59 }
 0x2ed   : > { %v1776_v61 = vld [vmem:[%s4479_s24 + $0x80] sm:%s2194_s7]  ;;  %1775 = vst [vmem:[%s4482_s25 + $0xa8] sm:%s2194_s7] %v1774_v60 }
 0x2ee   : > { %v1778_v20 = vld [vmem:[%s4479_s24 + $0xa0] sm:%s2194_s7]  ;;  %1777 = vst [vmem:[%s4482_s25 + $0xe0] sm:%s2194_s7] %v1776_v61 }
 0x2ef   : > { %v1780_v0 = vld [vmem:[%s4479_s24 + $0xc0] sm:%s2194_s7]  ;;  %1779 = vst [vmem:[%s4482_s25 + $0x118] sm:%s2194_s7] %v1778_v20 }
 0x2f0   : > { %1781 = vst [vmem:[%s4482_s25 + $0x150] sm:%s2194_s7] %v1780_v0 }
 0x2f1 PF: > { %p2195_p5 = scmp.ge.u32.totalorder %s4306_s17, 8 }
 0x2f2   : > { %s3082_s21 = smov (!%p2195_p5), 1  }
 0x2f3   : > { %1440 = sbr.rel (%p2195_p5) target bundleno = 768 (0x300), region = 180  ;;  %s1441_s24 = sshll.u32 (!%p2195_p5), %s3082_s21, %s4306_s17 }
 0x2f4   : > { %s2196_s25 = sadd.s32 (!%p2195_p5), 4294967295, %s1441_s24 }
 0x2f8   : > { %v1451_v21 = vld [vmem:[%s4187_s10] sm:%s2196_s25] }
 0x2f9   : > { %v1453_v25 = vld [vmem:[%s4187_s10 + $0x20] sm:%s2196_s25]  ;;  %1452 = vst [vmem:[%s4304_s22] sm:%s2196_s25] %v1451_v21 }
 0x2fa   : > { %v1455_v1 = vld [vmem:[%s4187_s10 + $0x40] sm:%s2196_s25]  ;;  %1454 = vst [vmem:[%s4304_s22 + $0x38] sm:%s2196_s25] %v1453_v25 }
 0x2fb   : > { %v1457_v33 = vld [vmem:[%s4187_s10 + $0x60] sm:%s2196_s25]  ;;  %1456 = vst [vmem:[%s4304_s22 + $0x70] sm:%s2196_s25] %v1455_v1 }
 0x2fc   : > { %v1459_v2 = vld [vmem:[%s4187_s10 + $0x80] sm:%s2196_s25]  ;;  %1458 = vst [vmem:[%s4304_s22 + $0xa8] sm:%s2196_s25] %v1457_v33 }
 0x2fd   : > { %v1461_v49 = vld [vmem:[%s4187_s10 + $0xa0] sm:%s2196_s25]  ;;  %1460 = vst [vmem:[%s4304_s22 + $0xe0] sm:%s2196_s25] %v1459_v2 }
 0x2fe   : > { %v1463_v5 = vld [vmem:[%s4187_s10 + $0xc0] sm:%s2196_s25]  ;;  %1462 = vst [vmem:[%s4304_s22 + $0x118] sm:%s2196_s25] %v1461_v49 }
 0x2ff   : > { %1464 = vst [vmem:[%s4304_s22 + $0x150] sm:%s2196_s25] %v1463_v5 }
 0x300 PF: > { %p10_p12 = scmp.ge.s32.totalorder %s3122_s16, 4   ;;  %s4745_s12 = smov %s2879_s13 }
 0x301   : > { %s4746_s13 = smov %s3132_s19  ;;  %s4747_s14 = smov %s3122_s16 }
 0x302   :  { %12 = sbr.rel (!%p10_p12) target bundleno = 2 (0x2), region = 462 }

</bundles_post_ra>
